<compile_context>
chip_gen: v7x
topology: tpu7x:2x2x1
jax: 0.10.0
libtpu: 0.0.40
codegen_flags: <defaults>
</compile_context>

<pallas_src>
import functools

import jax
import jax.numpy as jnp
from jax.experimental import pallas as pl
from jax.experimental.pallas import tpu as pltpu


# ----------------------------------------------------------------------------
# small helpers
# ----------------------------------------------------------------------------
def _rup(x, m):
    return (x + m - 1) // m * m


def _pick_tiles(M, K, N):
    """Adaptive (tm, tn, tk) + padded dims for the MXU matmul.

    * tm right-sized for small M (deep bottlenecks at tiny spatial).
    * tn chosen so a 'parallel' axis has >= 2 blocks when possible (v7x has
      2 TensorCores sharded over parallel grid axes).
    * tk as large as divides the padded K (fewer grid steps, same VMEM class).
    """
    Kp = _rup(K, 128)
    Np = _rup(N, 128)
    if M > 512:
        tm = 256
    else:
        tm = _rup(max(M, 8), 8)
    Mp = _rup(M, tm)
    gm = Mp // tm

    tn = 128
    for cand in (512, 256, 128):
        if Np % cand != 0:
            continue
        if gm >= 2 or Np // cand >= 2 or Np == cand == 128:
            tn = cand
            break

    tk = 128
    for cand in (1024, 512, 256, 128):
        if Kp % cand == 0:
            tk = cand
            break
    return tm, tn, tk, Mp, Kp, Np


def _pick_bm_div(Mp, cols, itemsize=2, target_bytes=2 << 20):
    """Rows per elementwise block: ~target_bytes, multiple of 8, divides Mp,
    and (when possible) leaves >= 2 blocks so both v7x cores get work."""
    bm = max(8, (target_bytes // (itemsize * max(cols, 1)) // 8) * 8)
    bm = min(bm, Mp)
    if bm >= Mp and Mp >= 16:
        half = (Mp // 2 // 8) * 8
        if half >= 8:
            bm = half
    while Mp % bm != 0:
        bm -= 8
    return bm


# ----------------------------------------------------------------------------
# Pallas kernels
# ----------------------------------------------------------------------------
def _mm_plain_kernel(a_ref, b_ref, s_ref, t_ref, o_ref, acc_ref):
    @pl.when(pl.program_id(2) == 0)
    def _():
        acc_ref[...] = jnp.zeros_like(acc_ref)

    acc_ref[...] += jnp.dot(a_ref[...], b_ref[...],
                            preferred_element_type=jnp.float32)

    @pl.when(pl.program_id(2) == pl.num_programs(2) - 1)
    def _():
        o_ref[...] = (acc_ref[...] * s_ref[...] + t_ref[...]).astype(o_ref.dtype)


def _mm_stats_kernel(a_ref, b_ref, o_ref, sum_ref, sq_ref, acc_ref):
    @pl.when(pl.program_id(2) == 0)
    def _():
        acc_ref[...] = jnp.zeros_like(acc_ref)

    acc_ref[...] += jnp.dot(a_ref[...], b_ref[...],
                            preferred_element_type=jnp.float32)

    @pl.when(pl.program_id(2) == pl.num_programs(2) - 1)
    def _():
        y = acc_ref[...]
        o_ref[...] = y.astype(o_ref.dtype)       # bf16 activation writeback
        # per-tile column statistics from the f32 accumulator -> BN batch
        # stats with no extra full-tensor HBM read
        sum_ref[...] = jnp.sum(y, axis=0)[None, None, :]
        sq_ref[...] = jnp.sum(y * y, axis=0)[None, None, :]


def _affine_kernel(x_ref, s_ref, t_ref, o_ref, *, relu):
    y = x_ref[...].astype(jnp.float32) * s_ref[...] + t_ref[...]
    if relu:
        y = jnp.maximum(y, 0.0)
    o_ref[...] = y.astype(o_ref.dtype)


def _add_relu_kernel(a_ref, b_ref, o_ref):
    y = a_ref[...].astype(jnp.float32) + b_ref[...].astype(jnp.float32)
    o_ref[...] = jnp.maximum(y, 0.0).astype(o_ref.dtype)


# ----------------------------------------------------------------------------
# cached pallas_call builders (one build per shape signature)
# ----------------------------------------------------------------------------
@functools.lru_cache(maxsize=None)
def _matmul_fn(Mp, Kp, Np, tm, tn, tk, stats):
    gm, gn, gk = Mp // tm, Np // tn, Kp // tk
    ab_specs = [pl.BlockSpec((tm, tk), lambda i, j, k: (i, k)),
                pl.BlockSpec((tk, tn), lambda i, j, k: (k, j))]
    if stats:
        kernel = _mm_stats_kernel
        in_specs = ab_specs
        out_shape = (jax.ShapeDtypeStruct((Mp, Np), jnp.bfloat16),
                     jax.ShapeDtypeStruct((gm, 1, Np), jnp.float32),
                     jax.ShapeDtypeStruct((gm, 1, Np), jnp.float32))
        out_specs = [pl.BlockSpec((tm, tn), lambda i, j, k: (i, j)),
                     pl.BlockSpec((1, 1, tn), lambda i, j, k: (i, 0, j)),
                     pl.BlockSpec((1, 1, tn), lambda i, j, k: (i, 0, j))]
    else:
        kernel = _mm_plain_kernel
        in_specs = ab_specs + [pl.BlockSpec((1, tn), lambda i, j, k: (0, j)),
                               pl.BlockSpec((1, tn), lambda i, j, k: (0, j))]
        out_shape = jax.ShapeDtypeStruct((Mp, Np), jnp.bfloat16)
        out_specs = pl.BlockSpec((tm, tn), lambda i, j, k: (i, j))

    cost = pl.CostEstimate(
        flops=2 * Mp * Np * Kp,
        transcendentals=0,
        bytes_accessed=2 * Mp * Kp + 2 * Kp * Np + 2 * Mp * Np)

    return pl.pallas_call(
        kernel,
        out_shape=out_shape,
        grid_spec=pltpu.PrefetchScalarGridSpec(
            num_scalar_prefetch=0,
            grid=(gm, gn, gk),
            in_specs=in_specs,
            out_specs=out_specs,
            scratch_shapes=[pltpu.VMEM((tm, tn), jnp.float32)]),
        compiler_params=pltpu.CompilerParams(
            dimension_semantics=("parallel", "parallel", "arbitrary"),
            vmem_limit_bytes=40 * 1024 * 1024),   # < 64 MiB (v7x) headroom
        cost_estimate=cost,
    )


@functools.lru_cache(maxsize=None)
def _affine_fn(Mp, C, bm, relu):
    return pl.pallas_call(
        functools.partial(_affine_kernel, relu=relu),
        out_shape=jax.ShapeDtypeStruct((Mp, C), jnp.bfloat16),
        grid_spec=pltpu.PrefetchScalarGridSpec(
            num_scalar_prefetch=0,
            grid=(Mp // bm,),
            in_specs=[pl.BlockSpec((bm, C), lambda i: (i, 0)),
                      pl.BlockSpec((1, C), lambda i: (0, 0)),
                      pl.BlockSpec((1, C), lambda i: (0, 0))],
            out_specs=pl.BlockSpec((bm, C), lambda i: (i, 0))),
        compiler_params=pltpu.CompilerParams(
            dimension_semantics=("parallel",),
            vmem_limit_bytes=32 * 1024 * 1024),
    )


@functools.lru_cache(maxsize=None)
def _add_relu_fn(Mp, C, bm):
    return pl.pallas_call(
        _add_relu_kernel,
        out_shape=jax.ShapeDtypeStruct((Mp, C), jnp.bfloat16),
        grid_spec=pltpu.PrefetchScalarGridSpec(
            num_scalar_prefetch=0,
            grid=(Mp // bm,),
            in_specs=[pl.BlockSpec((bm, C), lambda i: (i, 0)),
                      pl.BlockSpec((bm, C), lambda i: (i, 0))],
            out_specs=pl.BlockSpec((bm, C), lambda i: (i, 0))),
        compiler_params=pltpu.CompilerParams(
            dimension_semantics=("parallel",),
            vmem_limit_bytes=32 * 1024 * 1024),
    )


# ----------------------------------------------------------------------------
# wrappers around the Pallas kernels
# ----------------------------------------------------------------------------
def pallas_matmul(a, b, scale=None, shift=None, want_stats=False):
    """out = (A @ B) * scale + shift ; optional per-column sum / sum-of-sq.

    Operands cast to bf16 (MXU); accumulation in f32; output written bf16 and
    returned PADDED to (Mp, Np) so callers can feed it straight into the next
    (padded) elementwise kernel without a slice + re-pad round trip.
    """
    M, K = a.shape
    _, N = b.shape
    if want_stats:
        # padded A rows must yield exact zeros so the fused column stats stay
        # correct -> no scale/shift allowed together with want_stats.
        assert scale is None and shift is None
    tm, tn, tk, Mp, Kp, Np = _pick_tiles(M, K, N)

    a_p = jnp.pad(a.astype(jnp.bfloat16), ((0, Mp - M), (0, Kp - K)))
    b_p = jnp.pad(b.astype(jnp.bfloat16), ((0, Kp - K), (0, Np - N)))
    fn = _matmul_fn(Mp, Kp, Np, tm, tn, tk, bool(want_stats))

    if want_stats:
        out, csum, csq = fn(a_p, b_p)
        s1 = jnp.sum(csum[:, 0, :N], axis=0)
        s2 = jnp.sum(csq[:, 0, :N], axis=0)
        return out, s1, s2

    s = jnp.ones((N,), jnp.float32) if scale is None else jnp.asarray(scale, jnp.float32)
    t = jnp.zeros((N,), jnp.float32) if shift is None else jnp.asarray(shift, jnp.float32)
    s_p = jnp.pad(s, (0, Np - N)).reshape(1, Np)
    t_p = jnp.pad(t, (0, Np - N)).reshape(1, Np)
    return fn(a_p, b_p, s_p, t_p)


def affine2d(x2, scale, shift, relu):
    """y = x*scale + shift (+ReLU), per column; bf16 in / bf16 out."""
    M, C = x2.shape
    scale = jnp.asarray(scale, jnp.float32).reshape(1, C)
    shift = jnp.asarray(shift, jnp.float32).reshape(1, C)
    Mp = _rup(M, 8)
    xp = jnp.pad(x2, ((0, Mp - M), (0, 0))) if Mp != M else x2
    bm = _pick_bm_div(Mp, C)
    out = _affine_fn(Mp, C, bm, bool(relu))(xp.astype(jnp.bfloat16), scale, shift)
    return out[:M] if Mp != M else out


def add_relu(a, b):
    shp = a.shape
    C = shp[-1]
    a2 = a.reshape(-1, C)
    b2 = b.reshape(-1, C)
    M = a2.shape[0]
    Mp = _rup(M, 8)
    if Mp != M:
        a2 = jnp.pad(a2, ((0, Mp - M), (0, 0)))
        b2 = jnp.pad(b2, ((0, Mp - M), (0, 0)))
    bm = _pick_bm_div(Mp, C)
    out = _add_relu_fn(Mp, C, bm)(a2, b2)
    out = out[:M] if Mp != M else out
    return out.reshape(shp)


def maxpool_3x3_s2_p1(x):
    """3x3/s2/p1 max pool.  Pure XLA fusion of 9 strided views (bf16):
    no (9, M, C) tap stack is materialized -> one read + one write."""
    N, H, W, C = x.shape
    Ho = (H + 2 - 3) // 2 + 1
    Wo = (W + 2 - 3) // 2 + 1
    xp = jnp.pad(x, ((0, 0), (1, 1), (1, 1), (0, 0)),
                 constant_values=-jnp.inf)
    v = None
    for kh in range(3):
        for kw in range(3):
            tap = xp[:, kh:kh + 2 * (Ho - 1) + 1:2,
                     kw:kw + 2 * (Wo - 1) + 1:2, :]
            v = tap if v is None else jnp.maximum(v, tap)
    return v


# ----------------------------------------------------------------------------
# conv building blocks (NHWC activations, PyTorch OIHW weights)
# ----------------------------------------------------------------------------
def _im2col(x, KH, KW, stride, padding):
    x = x.astype(jnp.bfloat16)                         # bf16 patch matrix
    N, H, W, Cin = x.shape
    Ho = (H + 2 * padding - KH) // stride + 1
    Wo = (W + 2 * padding - KW) // stride + 1
    if KH == 1 and KW == 1 and stride == 1 and padding == 0:
        return x.reshape(N * H * W, Cin), (N, Ho, Wo)
    xp = jnp.pad(x, ((0, 0), (padding, padding), (padding, padding), (0, 0)))
    patches = []
    for kh in range(KH):
        for kw in range(KW):
            patches.append(xp[:, kh:kh + stride * (Ho - 1) + 1:stride,
                              kw:kw + stride * (Wo - 1) + 1:stride, :])
    pat = jnp.stack(patches, axis=3)                   # (N,Ho,Wo,KH*KW,Cin)
    return pat.reshape(N * Ho * Wo, KH * KW * Cin), (N, Ho, Wo)


def _wmat(w):
    Cout = w.shape[0]
    return jnp.transpose(w, (2, 3, 1, 0)).reshape(-1, Cout)


def conv_bn_act(x, w, gamma, beta, relu, stride=1, padding=0, eps=1e-5):
    """Conv2d (no bias) -> train-mode BatchNorm -> optional ReLU.

    The padded (Mp, Np) matmul output is fed straight into the BN-affine
    kernel (scale/shift padded with zeros); slicing happens only once, when
    reshaping back to NHWC for the next layer.
    """
    Cout, _, KH, KW = w.shape
    a, (N, Ho, Wo) = _im2col(x, KH, KW, stride, padding)
    M = a.shape[0]
    out_p, s1, s2 = pallas_matmul(a, _wmat(w), want_stats=True)
    mean = s1 / M
    var = jnp.maximum(s2 / M - mean * mean, 0.0)       # biased batch variance
    scale = gamma * jax.lax.rsqrt(var + eps)
    shift = beta - mean * scale
    Np = out_p.shape[1]
    scale_p = jnp.pad(scale, (0, Np - Cout))
    shift_p = jnp.pad(shift, (0, Np - Cout))
    y_p = affine2d(out_p, scale_p, shift_p, relu)      # bf16, still padded
    return y_p[:M, :Cout].reshape(N, Ho, Wo, Cout)


def conv_transpose2x2(x, w, b):
    """ConvTranspose2d(k=2, s=2); bias fused into the matmul epilogue."""
    # TODO(synk): the (kh,kw) interleave is still a full-tensor XLA transpose;
    #             a scattering output BlockSpec would remove that round trip.
    N, H, W, Cin = x.shape
    _, Cout, KH, KW = w.shape
    wmat = jnp.transpose(w, (0, 2, 3, 1)).reshape(Cin, KH * KW * Cout)
    shift = jnp.tile(jnp.asarray(b, jnp.float32), KH * KW)
    M = N * H * W
    Ncols = KH * KW * Cout
    out_p = pallas_matmul(x.reshape(M, Cin).astype(jnp.bfloat16), wmat,
                          shift=shift)
    out = out_p[:M, :Ncols].reshape(N, H, W, KH, KW, Cout)
    out = jnp.transpose(out, (0, 1, 3, 2, 4, 5)).reshape(N, H * KH, W * KW, Cout)
    return out


def bilinear_resize(x, out_h, out_w):
    """align_corners=False bilinear (matches F.interpolate). Tiny: XLA glue."""
    N, H, W, C = x.shape

    def coords(out_size, in_size):
        scale = in_size / out_size
        src = jnp.clip((jnp.arange(out_size) + 0.5) * scale - 0.5, 0.0, None)
        i0 = jnp.minimum(jnp.floor(src).astype(jnp.int32), in_size - 1)
        i1 = jnp.minimum(i0 + 1, in_size - 1)
        w1 = src - i0.astype(jnp.float32)
        return i0, i1, w1

    h0, h1, wh = coords(out_h, H)
    w0, w1, ww = coords(out_w, W)

    def gw(xr):
        return (xr[:, :, w0, :] * (1.0 - ww)[None, None, :, None]
                + xr[:, :, w1, :] * ww[None, None, :, None])

    row0 = gw(x[:, h0, :, :])
    row1 = gw(x[:, h1, :, :])
    return row0 * (1.0 - wh)[None, :, None, None] + row1 * wh[None, :, None, None]


# ----------------------------------------------------------------------------
# Parameter construction (deterministic, synthetic)
# ----------------------------------------------------------------------------
class _PGen:
    def __init__(self, key):
        self.key = key
        self.i = 0

    def __call__(self, shape, scale=0.05):
        k = jax.random.fold_in(self.key, self.i)
        self.i += 1
        return scale * jax.random.normal(k, shape, dtype=jnp.float32)


def _bn_p(c):
    return (jnp.ones((c,), jnp.float32), jnp.zeros((c,), jnp.float32))


def _bottleneck_params(pg, inplanes, planes, stride):
    p = dict(conv1=pg((planes, inplanes, 1, 1)), bn1=_bn_p(planes),
             conv2=pg((planes, planes, 3, 3)), bn2=_bn_p(planes),
             conv3=pg((planes * 4, planes, 1, 1)), bn3=_bn_p(planes * 4))
    if stride != 1 or inplanes != planes * 4:
        p['down'] = pg((planes * 4, inplanes, 1, 1))
        p['down_bn'] = _bn_p(planes * 4)
    return p


_LAYER_CFG = [(64, 3, 1), (128, 4, 2), (256, 6, 2), (512, 3, 2)]


def init_params(key):
    pg = _PGen(key)
    P = {}
    P['conv1'] = pg((64, 3, 7, 7))
    P['bn1'] = _bn_p(64)
    inplanes = 64
    P['layers'] = []
    for planes, blocks, stride in _LAYER_CFG:
        layer = []
        for b in range(blocks):
            s = stride if b == 0 else 1
            layer.append(_bottleneck_params(pg, inplanes, planes, s))
            inplanes = planes * 4
        P['layers'].append(layer)
    # encoder channel shapes (reversed), as derived by get_encoder_shapes:
    enc_ch = [2048, 1024, 512, 256, 64]
    P['ups'] = []
    for i in range(len(enc_ch) - 1):
        in_ch, out_ch = enc_ch[i], enc_ch[i + 1]
        P['ups'].append(dict(
            up_w=pg((in_ch, out_ch, 2, 2)), up_b=pg((out_ch,)),
            # c1_b / c2_b exist in the PyTorch module but are exactly
            # cancelled by the following batch-statistics BatchNorm.
            c1_w=pg((out_ch, out_ch * 2, 3, 3)), c1_b=pg((out_ch,)), bn1=_bn_p(out_ch),
            c2_w=pg((out_ch, out_ch, 3, 3)), c2_b=pg((out_ch,)), bn2=_bn_p(out_ch)))
    P['final_w'] = pg((1, 64, 1, 1))
    P['final_b'] = pg((1,))
    return P


# ----------------------------------------------------------------------------
# Forward pass (jitted per repeated sub-block: glue fuses with the Pallas
# calls while identical-shape blocks reuse one compiled executable)
# ----------------------------------------------------------------------------
def _stem_forward(x_nchw, w, gamma, beta):
    x = jnp.transpose(x_nchw, (0, 2, 3, 1)).astype(jnp.bfloat16)  # NCHW->NHWC
    x0 = conv_bn_act(x, w, gamma, beta, relu=True, stride=2, padding=3)
    x1 = maxpool_3x3_s2_p1(x0)
    return x0, x1


def _bottleneck_forward(x, p, stride):
    identity = x
    out = conv_bn_act(x, p['conv1'], *p['bn1'], relu=True)
    out = conv_bn_act(out, p['conv2'], *p['bn2'], relu=True,
                      stride=stride, padding=1)
    out = conv_bn_act(out, p['conv3'], *p['bn3'], relu=False)
    if 'down' in p:
        identity = conv_bn_act(x, p['down'], *p['down_bn'], relu=False,
                               stride=stride)
    return add_relu(out, identity)


def _upblock_forward(x, skip, p):
    x = conv_transpose2x2(x, p['up_w'], p['up_b'])
    x = jnp.concatenate([x, skip], axis=-1)            # channel concat (NHWC)
    # conv biases (c1_b/c2_b) are exactly absorbed by batch-stat BatchNorm.
    x = conv_bn_act(x, p['c1_w'], *p['bn1'], relu=True, padding=1)
    x = conv_bn_act(x, p['c2_w'], *p['bn2'], relu=True, padding=1)
    return x


def _head_forward(z, w, b, out_h, out_w):
    # 1x1 conv with a single output class -> plain XLA matvec (a 128-padded
    # MXU tile would be 99% padding); then bilinear upsample in f32.
    Cin = w.shape[1]
    wv = jnp.asarray(w, jnp.float32).reshape(w.shape[0], Cin).T   # (Cin, n_cls)
    logits = jnp.einsum('nhwc,ck->nhwk', z.astype(jnp.float32), wv)
    logits = logits + jnp.asarray(b, jnp.float32)
    out = bilinear_resize(logits, out_h, out_w)
    return jnp.transpose(out, (0, 3, 1, 2))            # NHWC -> NCHW


_stem_jit = jax.jit(_stem_forward)
_bottleneck_jit = jax.jit(_bottleneck_forward, static_argnames=("stride",))
_upblock_jit = jax.jit(_upblock_forward)
_head_jit = jax.jit(_head_forward, static_argnames=("out_h", "out_w"))


def _layer_forward(x, layer_params, first_stride):
    for b, p in enumerate(layer_params):
        x = _bottleneck_jit(x, p, stride=(first_stride if b == 0 else 1))
    return x


def transfer_segmentation_forward(x_nchw, params):
    x0, x1 = _stem_jit(x_nchw, params['conv1'], *params['bn1'])
    x2 = _layer_forward(x1, params['layers'][0], 1)
    x3 = _layer_forward(x2, params['layers'][1], 2)
    x4 = _layer_forward(x3, params['layers'][2], 2)
    x5 = _layer_forward(x4, params['layers'][3], 2)
    z = _upblock_jit(x5, x4, params['ups'][0])
    z = _upblock_jit(z, x3, params['ups'][1])
    z = _upblock_jit(z, x2, params['ups'][2])
    z = _upblock_jit(z, x0, params['ups'][3])
    return _head_jit(z, params['final_w'], params['final_b'],
                     out_h=x_nchw.shape[2], out_w=x_nchw.shape[3])


# ----------------------------------------------------------------------------
if __name__ == "__main__":
    key = jax.random.PRNGKey(0)
    params = init_params(key)
    # input must have 3 channels (ResNet50 stem); spatial divisible by 32 so
    # the decoder skip connections align (64x64 is the smallest clean size).
    x = jax.random.normal(jax.random.fold_in(key, 999), (1, 3, 64, 64),
                          dtype=jnp.float32)
    out = transfer_segmentation_forward(x, params)
    out = jax.block_until_ready(out)
    assert out.shape == (1, 1, 64, 64), out.shape
    assert jnp.all(jnp.isfinite(out))
    print("KERNEL_OK")
</pallas_src>

<mosaic_0001>
module attributes {stable_mosaic.version = 11 : i64} {
  func.func @_mm_stats_kernel(%arg0: i32, %arg1: i32, %arg2: i32, %arg3: memref<256x256xbf16, #tpu.memory_space<vmem>>, %arg4: memref<256x128xbf16, #tpu.memory_space<vmem>>, %arg5: memref<256x128xbf16, #tpu.memory_space<vmem>>, %arg6: memref<1x1x128xf32, #tpu.memory_space<vmem>>, %arg7: memref<1x1x128xf32, #tpu.memory_space<vmem>>, %arg8: memref<256x128xf32, #tpu.memory_space<vmem>>) attributes {dimension_semantics = [#tpu.dimension_semantics<parallel>, #tpu.dimension_semantics<parallel>, #tpu.dimension_semantics<arbitrary>], iteration_bounds = array<i64: 4, 1, 1>, scalar_prefetch = 0 : i64, scratch_operands = 1 : i64, tpu.core_type = #tpu.core_type<tc>, window_params = [{transform_indices = @transform_0, window_bounds = array<i64: 256, 256>}, {transform_indices = @transform_1, window_bounds = array<i64: 256, 128>}, {transform_indices = @transform_2, window_bounds = array<i64: 256, 128>}, {transform_indices = @transform_3, window_bounds = array<i64: 1, 1, 128>}, {transform_indices = @transform_4, window_bounds = array<i64: 1, 1, 128>}]} {
    %c0_i32 = arith.constant 0 : i32
    %0 = arith.cmpi eq, %arg2, %c0_i32 : i32
    %1 = arith.extui %0 : i1 to i32
    %c0_i32_0 = arith.constant 0 : i32
    %2 = arith.cmpi ne, %1, %c0_i32_0 : i32
    scf.if %2 {
      %cst_10 = arith.constant 0.000000e+00 : f32
      %12 = vector.broadcast %cst_10 : f32 to vector<256x128xf32>
      %c0_11 = arith.constant 0 : index
      %c0_12 = arith.constant 0 : index
      %13 = vector.load %arg8[%c0_11, %c0_12] : memref<256x128xf32, #tpu.memory_space<vmem>>, vector<256x128xf32>
      tpu.vector_store %arg8[%c0_11, %c0_12], %12 {strides = array<i32>} : memref<256x128xf32, #tpu.memory_space<vmem>>, vector<256x128xf32>,
    } else {
    }
    %c0 = arith.constant 0 : index
    %c0_1 = arith.constant 0 : index
    %3 = vector.load %arg8[%c0, %c0_1] : memref<256x128xf32, #tpu.memory_space<vmem>>, vector<256x128xf32>
    %c0_2 = arith.constant 0 : index
    %c0_3 = arith.constant 0 : index
    %4 = vector.load %arg3[%c0_2, %c0_3] : memref<256x256xbf16, #tpu.memory_space<vmem>>, vector<256x256xbf16>
    %c0_4 = arith.constant 0 : index
    %c0_5 = arith.constant 0 : index
    %5 = vector.load %arg4[%c0_4, %c0_5] : memref<256x128xbf16, #tpu.memory_space<vmem>>, vector<256x128xbf16>
    %cst = arith.constant dense<0.000000e+00> : vector<256x128xf32>
    %6 = tpu.matmul %4, %5, %cst {dimension_numbers = #tpu.dot_dimension_numbers<[1], [0], [0], [1], [0, 0, 1, 1], [], []>} : vector<256x256xbf16>, vector<256x128xbf16>, vector<256x128xf32> -> vector<256x128xf32>
    %7 = arith.addf %3, %6 : vector<256x128xf32>
    %c0_6 = arith.constant 0 : index
    %c0_7 = arith.constant 0 : index
    %8 = vector.load %arg8[%c0_6, %c0_7] : memref<256x128xf32, #tpu.memory_space<vmem>>, vector<256x128xf32>
    tpu.vector_store %arg8[%c0_6, %c0_7], %7 {strides = array<i32>} : memref<256x128xf32, #tpu.memory_space<vmem>>, vector<256x128xf32>,
    %c0_i32_8 = arith.constant 0 : i32
    %9 = arith.cmpi eq, %arg2, %c0_i32_8 : i32
    %10 = arith.extui %9 : i1 to i32
    %c0_i32_9 = arith.constant 0 : i32
    %11 = arith.cmpi ne, %10, %c0_i32_9 : i32
    scf.if %11 {
      %c0_10 = arith.constant 0 : index
      %c0_11 = arith.constant 0 : index
      %12 = vector.load %arg8[%c0_10, %c0_11] : memref<256x128xf32, #tpu.memory_space<vmem>>, vector<256x128xf32>
      %13 = arith.truncf %12 : vector<256x128xf32> to vector<256x128xbf16>
      %c0_12 = arith.constant 0 : index
      %c0_13 = arith.constant 0 : index
      %14 = vector.load %arg5[%c0_12, %c0_13] : memref<256x128xbf16, #tpu.memory_space<vmem>>, vector<256x128xbf16>
      tpu.vector_store %arg5[%c0_12, %c0_13], %13 {strides = array<i32>} : memref<256x128xbf16, #tpu.memory_space<vmem>>, vector<256x128xbf16>,
      %cst_14 = arith.constant dense<0.000000e+00> : vector<128xf32>
      %15 = vector.multi_reduction <add>, %12, %cst_14 [0] : vector<256x128xf32> to vector<128xf32>
      %16 = vector.shape_cast %15 : vector<128xf32> to vector<1x1x128xf32>
      %c0_15 = arith.constant 0 : index
      %c0_16 = arith.constant 0 : index
      %c0_17 = arith.constant 0 : index
      %17 = vector.load %arg6[%c0_15, %c0_16, %c0_17] : memref<1x1x128xf32, #tpu.memory_space<vmem>>, vector<1x1x128xf32>
      tpu.vector_store %arg6[%c0_15, %c0_16, %c0_17], %16 {strides = array<i32>} : memref<1x1x128xf32, #tpu.memory_space<vmem>>, vector<1x1x128xf32>,
      %18 = arith.mulf %12, %12 : vector<256x128xf32>
      %cst_18 = arith.constant dense<0.000000e+00> : vector<128xf32>
      %19 = vector.multi_reduction <add>, %18, %cst_18 [0] : vector<256x128xf32> to vector<128xf32>
      %20 = vector.shape_cast %19 : vector<128xf32> to vector<1x1x128xf32>
      %c0_19 = arith.constant 0 : index
      %c0_20 = arith.constant 0 : index
      %c0_21 = arith.constant 0 : index
      %21 = vector.load %arg7[%c0_19, %c0_20, %c0_21] : memref<1x1x128xf32, #tpu.memory_space<vmem>>, vector<1x1x128xf32>
      tpu.vector_store %arg7[%c0_19, %c0_20, %c0_21], %20 {strides = array<i32>} : memref<1x1x128xf32, #tpu.memory_space<vmem>>, vector<1x1x128xf32>,
    } else {
    }
    return
  }
  func.func @transform_0(%arg0: i32, %arg1: i32, %arg2: i32) -> (i32, i32) {
    %c0_i32 = arith.constant 0 : i32
    return %arg0, %arg2 : i32, i32
  }
  func.func @transform_1(%arg0: i32, %arg1: i32, %arg2: i32) -> (i32, i32) {
    %c0_i32 = arith.constant 0 : i32
    return %arg2, %arg1 : i32, i32
  }
  func.func @transform_2(%arg0: i32, %arg1: i32, %arg2: i32) -> (i32, i32) {
    %c0_i32 = arith.constant 0 : i32
    return %arg0, %arg1 : i32, i32
  }
  func.func @transform_3(%arg0: i32, %arg1: i32, %arg2: i32) -> (i32, i32, i32) {
    %c0_i32 = arith.constant 0 : i32
    %c0_i32_0 = arith.constant 0 : i32
    return %arg0, %c0_i32, %arg1 : i32, i32, i32
  }
  func.func @transform_4(%arg0: i32, %arg1: i32, %arg2: i32) -> (i32, i32, i32) {
    %c0_i32 = arith.constant 0 : i32
    %c0_i32_0 = arith.constant 0 : i32
    return %arg0, %c0_i32, %arg1 : i32, i32, i32
  }
}

module attributes {stable_mosaic.version = 11 : i64} {
  func.func @_affine_kernel(%arg0: i32, %arg1: memref<512x128xbf16, #tpu.memory_space<vmem>>, %arg2: memref<1x128xf32, #tpu.memory_space<vmem>>, %arg3: memref<1x128xf32, #tpu.memory_space<vmem>>, %arg4: memref<512x128xbf16, #tpu.memory_space<vmem>>) attributes {dimension_semantics = [#tpu.dimension_semantics<parallel>], iteration_bounds = array<i64: 2>, scalar_prefetch = 0 : i64, scratch_operands = 0 : i64, tpu.core_type = #tpu.core_type<tc>, window_params = [{transform_indices = @transform_0, window_bounds = array<i64: 512, 128>}, {pipeline_mode = #tpu.pipeline_mode<synchronous>, transform_indices = @transform_1, window_bounds = array<i64: 1, 128>}, {pipeline_mode = #tpu.pipeline_mode<synchronous>, transform_indices = @transform_2, window_bounds = array<i64: 1, 128>}, {transform_indices = @transform_3, window_bounds = array<i64: 512, 128>}]} {
    %c0 = arith.constant 0 : index
    %c0_0 = arith.constant 0 : index
    %0 = vector.load %arg1[%c0, %c0_0] : memref<512x128xbf16, #tpu.memory_space<vmem>>, vector<512x128xbf16>
    %1 = arith.extf %0 : vector<512x128xbf16> to vector<512x128xf32>
    %c0_1 = arith.constant 0 : index
    %c0_2 = arith.constant 0 : index
    %2 = vector.load %arg2[%c0_1, %c0_2] : memref<1x128xf32, #tpu.memory_space<vmem>>, vector<1x128xf32>
    %3 = vector.broadcast %2 : vector<1x128xf32> to vector<512x128xf32>
    %4 = arith.mulf %1, %3 : vector<512x128xf32>
    %c0_3 = arith.constant 0 : index
    %c0_4 = arith.constant 0 : index
    %5 = vector.load %arg3[%c0_3, %c0_4] : memref<1x128xf32, #tpu.memory_space<vmem>>, vector<1x128xf32>
    %6 = vector.broadcast %5 : vector<1x128xf32> to vector<512x128xf32>
    %7 = arith.addf %4, %6 : vector<512x128xf32>
    %cst = arith.constant 0.000000e+00 : f32
    %8 = vector.broadcast %cst : f32 to vector<512x128xf32>
    %9 = arith.maximumf %7, %8 : vector<512x128xf32>
    %10 = arith.truncf %9 : vector<512x128xf32> to vector<512x128xbf16>
    %c0_5 = arith.constant 0 : index
    %c0_6 = arith.constant 0 : index
    %11 = vector.load %arg4[%c0_5, %c0_6] : memref<512x128xbf16, #tpu.memory_space<vmem>>, vector<512x128xbf16>
    tpu.vector_store %arg4[%c0_5, %c0_6], %10 {strides = array<i32>} : memref<512x128xbf16, #tpu.memory_space<vmem>>, vector<512x128xbf16>,
    return
  }
  func.func @transform_0(%arg0: i32) -> (i32, i32) {
    %c0_i32 = arith.constant 0 : i32
    %c0_i32_0 = arith.constant 0 : i32
    return %arg0, %c0_i32 : i32, i32
  }
  func.func @transform_1(%arg0: i32) -> (i32, i32) {
    %c0_i32 = arith.constant 0 : i32
    %c0_i32_0 = arith.constant 0 : i32
    %c0_i32_1 = arith.constant 0 : i32
    return %c0_i32, %c0_i32_0 : i32, i32
  }
  func.func @transform_2(%arg0: i32) -> (i32, i32) {
    %c0_i32 = arith.constant 0 : i32
    %c0_i32_0 = arith.constant 0 : i32
    %c0_i32_1 = arith.constant 0 : i32
    return %c0_i32, %c0_i32_0 : i32, i32
  }
  func.func @transform_3(%arg0: i32) -> (i32, i32) {
    %c0_i32 = arith.constant 0 : i32
    %c0_i32_0 = arith.constant 0 : i32
    return %arg0, %c0_i32 : i32, i32
  }
}

</mosaic_0001>

<bundles_post_ra>
// kernel: _stem_forward.3
= control target key start
LH: loop header
LB: loop body
LE: loop exit
PB: predicated region body
PF: predicated region fallthrough
CT: control target
= control target key end

     0   :  { %s1411_s12 = smov 0   ;;  %s1641_s0 = inlined_call_operand.vmem [shape: bf16[1024,128], index: 0, kind: input, shape index: {}]   ;;  %s1642_s1 = inlined_call_operand.vmem [shape: f32[1,128], index: 1, kind: input, shape index: {}]   ;;  %s1643_s2 = inlined_call_operand.vmem [shape: f32[1,128], index: 2, kind: input, shape index: {}]   ;;  %s1644_s3 = inlined_call_operand.vmem [shape: bf16[1024,128], index: 3, kind: output, shape index: {}]  }
   0x1 LB: > { %s884_s13 = sadd.s32 4294967295, %s1389_s12   ;;  %p888_p0 = scmp.ge.s32.totalorder %s1389_s12, 1  ;;  %s1389_s12 = sphi %s1411_s12, %s13_s12  }
   0x2   : > { %p138_p1 = scmp.lt.s32.totalorder %s1389_s12, 3 }
   0x4   : > { %p139_p2 = pnand %p888_p0, %p138_p1 }
   0x5   : > { %s889_s14 = sshll.u32 (!%p139_p2), %s884_s13, 6  ;;  %v1432_v0 = vld [vmem:[%s1642_s1] ss:$0 sm:$0xff] (!%p139_p2) }
   0x6   : > { %142 = sbr.rel (%p139_p2) target bundleno = 95 (0x5f), region = 32  ;;  %p163_p3 = scmp.lt.s32.totalorder (!%p139_p2), %s889_s14, 127  ;;  %v1441_v9 = vld [vmem:[%s1643_s2] ss:$0 sm:$0xff] (!%p139_p2) }
   0xd   : > { %s1646_s14 = smov (!%p163_p3, %s889_s14), 127 }
   0xe   : > { %s890_s15 = sshll.u32 %s1646_s14, 2 }
   0xf   : > { %s1427_s18 = scalar_lea.vmem %s1641_s0, %s890_s15  ;;  %s1466_s25 = scalar_lea.vmem %s1644_s3, %s890_s15 }
  0x10   : > { %v1026_v1 = vld [vmem:[%s1427_s18] sm:$0xff]   ;;  %v1313_v2 = vld [vmem:[%s1427_s18 + $0x8] sm:$0xff]   ;;  %v1314_v3 = vld [vmem:[%s1427_s18 + $0x10] sm:$0xff]  }
  0x11   : > { %v1027_v4 = vunpack.c.l.bf16 %v1026_v1  ;;  %v1028_v5 = vunpack.c.h.bf16 %v1026_v1  ;;  %v1031_v6 = vunpack.c.l.bf16 %v1313_v2  ;;  %v1032_v7 = vunpack.c.h.bf16 %v1313_v2  ;;  %v1315_v8 = vld [vmem:[%s1427_s18 + $0x18] sm:$0xff]   ;;  %v1316_v30 = vld [vmem:[%s1427_s18 + $0x20] sm:$0xff]   ;;  %v1317_v35 = vld [vmem:[%s1427_s18 + $0x28] sm:$0xff]  }
  0x12   : > { %v1035_v10 = vunpack.c.l.bf16 %v1314_v3  ;;  %v1036_v11 = vunpack.c.h.bf16 %v1314_v3  ;;  %v1039_v12 = vunpack.c.l.bf16 %v1315_v8  ;;  %v1040_v13 = vunpack.c.h.bf16 %v1315_v8  ;;  %v1318_v40 = vld [vmem:[%s1427_s18 + $0x30] sm:$0xff]   ;;  %v1319_v45 = vld [vmem:[%s1427_s18 + $0x38] sm:$0xff]   ;;  %v1320_v3 = vld [vmem:[%s1427_s18 + $0x40] sm:$0xff]  }
  0x13   : > { %v309_v14 = vmul.f32 %v1027_v4, %v1432_v0  ;;  %v310_v15 = vmul.f32 %v1028_v5, %v1432_v0  ;;  %v311_v16 = vmul.f32 %v1031_v6, %v1432_v0  ;;  %v312_v17 = vmul.f32 %v1032_v7, %v1432_v0 }
  0x14   : > { %v313_v18 = vmul.f32 %v1035_v10, %v1432_v0  ;;  %v314_v19 = vmul.f32 %v1036_v11, %v1432_v0  ;;  %v315_v20 = vmul.f32 %v1039_v12, %v1432_v0  ;;  %v316_v21 = vmul.f32 %v1040_v13, %v1432_v0  ;;  %v1321_v13 = vld [vmem:[%s1427_s18 + $0x48] sm:$0xff]  }
  0x15   : > { %v380_v22 = vadd.f32 %v1441_v9, %v309_v14  ;;  %v381_v23 = vadd.f32 %v1441_v9, %v310_v15  ;;  %v382_v24 = vadd.f32 %v1441_v9, %v311_v16  ;;  %v383_v25 = vadd.f32 %v1441_v9, %v312_v17 }
  0x16   : > { %v384_v26 = vadd.f32 %v1441_v9, %v313_v18  ;;  %v385_v27 = vadd.f32 %v1441_v9, %v314_v19  ;;  %v386_v28 = vadd.f32 %v1441_v9, %v315_v20  ;;  %v387_v29 = vadd.f32 %v1441_v9, %v316_v21  ;;  %v1322_v18 = vld [vmem:[%s1427_s18 + $0x50] sm:$0xff]  }
  0x17   : > { %v444_v31 = vmax.f32 %v380_v22, 0.0  ;;  %v445_v32 = vmax.f32 %v381_v23, 0.0  ;;  %v446_v33 = vmax.f32 %v382_v24, 0.0  ;;  %v447_v34 = vmax.f32 %v383_v25, 0.0  ;;  %v1323_v23 = vld [vmem:[%s1427_s18 + $0x58] sm:$0xff]  }
  0x18   : > { %v448_v36 = vmax.f32 %v384_v26, 0.0  ;;  %v449_v37 = vmax.f32 %v385_v27, 0.0  ;;  %v450_v38 = vmax.f32 %v386_v28, 0.0  ;;  %v451_v39 = vmax.f32 %v387_v29, 0.0 }
  0x19   : > { %v1156_v41 = vpack.c.bf16 %v445_v32, %v444_v31  ;;  %v1161_v42 = vpack.c.bf16 %v447_v34, %v446_v33  ;;  %v1043_v43 = vunpack.c.l.bf16 %v1316_v30  ;;  %v1044_v44 = vunpack.c.h.bf16 %v1316_v30 }
  0x1a   : > { %v1166_v46 = vpack.c.bf16 %v449_v37, %v448_v36  ;;  %v1171_v47 = vpack.c.bf16 %v451_v39, %v450_v38  ;;  %v1047_v48 = vunpack.c.l.bf16 %v1317_v35  ;;  %v1048_v49 = vunpack.c.h.bf16 %v1317_v35 }
  0x1b   : > { %1157 = vst [vmem:[%s1466_s25] sm:$0xff] %v1156_v41   ;;  %1344 = vst [vmem:[%s1466_s25 + $0x8] sm:$0xff] %v1161_v42   ;;  %v317_v50 = vmul.f32 %v1043_v43, %v1432_v0  ;;  %v318_v51 = vmul.f32 %v1044_v44, %v1432_v0  ;;  %v1051_v52 = vunpack.c.l.bf16 %v1318_v40  ;;  %v1052_v53 = vunpack.c.h.bf16 %v1318_v40  ;;  %v1324_v40 = vld [vmem:[%s1427_s18 + $0x60] sm:$0xff]  }
  0x1c   : > { %1345 = vst [vmem:[%s1466_s25 + $0x10] sm:$0xff] %v1166_v46   ;;  %1346 = vst [vmem:[%s1466_s25 + $0x18] sm:$0xff] %v1171_v47   ;;  %v319_v54 = vmul.f32 %v1047_v48, %v1432_v0  ;;  %v320_v55 = vmul.f32 %v1048_v49, %v1432_v0  ;;  %v1055_v56 = vunpack.c.l.bf16 %v1319_v45  ;;  %v1056_v57 = vunpack.c.h.bf16 %v1319_v45 }
  0x1d   : > { %v388_v58 = vadd.f32 %v1441_v9, %v317_v50  ;;  %v389_v59 = vadd.f32 %v1441_v9, %v318_v51  ;;  %v321_v60 = vmul.f32 %v1051_v52, %v1432_v0  ;;  %v322_v61 = vmul.f32 %v1052_v53, %v1432_v0  ;;  %v1325_v53 = vld [vmem:[%s1427_s18 + $0x68] sm:$0xff]  }
  0x1e   : > { %v390_v62 = vadd.f32 %v1441_v9, %v319_v54  ;;  %v391_v63 = vadd.f32 %v1441_v9, %v320_v55  ;;  %v323_v1 = vmul.f32 %v1055_v56, %v1432_v0  ;;  %v324_v2 = vmul.f32 %v1056_v57, %v1432_v0 }
  0x1f   : > { %v452_v4 = vmax.f32 %v388_v58, 0.0  ;;  %v453_v5 = vmax.f32 %v389_v59, 0.0  ;;  %v392_v6 = vadd.f32 %v1441_v9, %v321_v60  ;;  %v393_v7 = vadd.f32 %v1441_v9, %v322_v61  ;;  %v1326_v58 = vld [vmem:[%s1427_s18 + $0x70] sm:$0xff]  }
  0x20   : > { %v454_v8 = vmax.f32 %v390_v62, 0.0  ;;  %v455_v10 = vmax.f32 %v391_v63, 0.0  ;;  %v394_v11 = vadd.f32 %v1441_v9, %v323_v1  ;;  %v395_v12 = vadd.f32 %v1441_v9, %v324_v2  ;;  %v1327_v63 = vld [vmem:[%s1427_s18 + $0x78] sm:$0xff]  }
  0x21   : > { %v1176_v14 = vpack.c.bf16 %v453_v5, %v452_v4  ;;  %v456_v15 = vmax.f32 %v392_v6, 0.0  ;;  %v457_v16 = vmax.f32 %v393_v7, 0.0  ;;  %v1059_v17 = vunpack.c.l.bf16 %v1320_v3 }
  0x22   : > { %v1181_v19 = vpack.c.bf16 %v455_v10, %v454_v8  ;;  %v458_v20 = vmax.f32 %v394_v11, 0.0  ;;  %v459_v21 = vmax.f32 %v395_v12, 0.0  ;;  %v1060_v22 = vunpack.c.h.bf16 %v1320_v3 }
  0x23   : > { %1347 = vst [vmem:[%s1466_s25 + $0x20] sm:$0xff] %v1176_v14   ;;  %v1186_v24 = vpack.c.bf16 %v457_v16, %v456_v15  ;;  %v325_v25 = vmul.f32 %v1059_v17, %v1432_v0  ;;  %v1063_v26 = vunpack.c.l.bf16 %v1321_v13  ;;  %v1064_v27 = vunpack.c.h.bf16 %v1321_v13  ;;  %v1328_v14 = vld [vmem:[%s1427_s18 + $0x80] sm:$0xff]  }
  0x24   : > { %1348 = vst [vmem:[%s1466_s25 + $0x28] sm:$0xff] %v1181_v19   ;;  %v1191_v28 = vpack.c.bf16 %v459_v21, %v458_v20  ;;  %v326_v29 = vmul.f32 %v1060_v22, %v1432_v0  ;;  %v1067_v30 = vunpack.c.l.bf16 %v1322_v18  ;;  %v1068_v31 = vunpack.c.h.bf16 %v1322_v18 }
  0x25   : > { %1349 = vst [vmem:[%s1466_s25 + $0x30] sm:$0xff] %v1186_v24   ;;  %v396_v32 = vadd.f32 %v1441_v9, %v325_v25  ;;  %v327_v33 = vmul.f32 %v1063_v26, %v1432_v0  ;;  %v328_v34 = vmul.f32 %v1064_v27, %v1432_v0  ;;  %v1071_v35 = vunpack.c.l.bf16 %v1323_v23 }
  0x26   : > { %1350 = vst [vmem:[%s1466_s25 + $0x38] sm:$0xff] %v1191_v28   ;;  %v397_v36 = vadd.f32 %v1441_v9, %v326_v29  ;;  %v329_v37 = vmul.f32 %v1067_v30, %v1432_v0  ;;  %v330_v38 = vmul.f32 %v1068_v31, %v1432_v0  ;;  %v1072_v39 = vunpack.c.h.bf16 %v1323_v23  ;;  %v1329_v31 = vld [vmem:[%s1427_s18 + $0x88] sm:$0xff]  }
  0x27   : > { %v460_v41 = vmax.f32 %v396_v32, 0.0  ;;  %v398_v42 = vadd.f32 %v1441_v9, %v327_v33  ;;  %v399_v43 = vadd.f32 %v1441_v9, %v328_v34  ;;  %v331_v44 = vmul.f32 %v1071_v35, %v1432_v0 }
  0x28   : > { %v461_v45 = vmax.f32 %v397_v36, 0.0  ;;  %v400_v46 = vadd.f32 %v1441_v9, %v329_v37  ;;  %v401_v47 = vadd.f32 %v1441_v9, %v330_v38  ;;  %v332_v48 = vmul.f32 %v1072_v39, %v1432_v0  ;;  %v1330_v36 = vld [vmem:[%s1427_s18 + $0x90] sm:$0xff]  }
  0x29   : > { %v462_v49 = vmax.f32 %v398_v42, 0.0  ;;  %v463_v50 = vmax.f32 %v399_v43, 0.0  ;;  %v402_v51 = vadd.f32 %v1441_v9, %v331_v44  ;;  %v1075_v52 = vunpack.c.l.bf16 %v1324_v40 }
  0x2a   : > { %v1196_v54 = vpack.c.bf16 %v461_v45, %v460_v41  ;;  %v464_v55 = vmax.f32 %v400_v46, 0.0  ;;  %v465_v56 = vmax.f32 %v401_v47, 0.0  ;;  %v403_v57 = vadd.f32 %v1441_v9, %v332_v48  ;;  %v1331_v41 = vld [vmem:[%s1427_s18 + $0x98] sm:$0xff]  }
  0x2b   : > { %v1201_v59 = vpack.c.bf16 %v463_v50, %v462_v49  ;;  %v466_v60 = vmax.f32 %v402_v51, 0.0  ;;  %v1076_v61 = vunpack.c.h.bf16 %v1324_v40  ;;  %v333_v62 = vmul.f32 %v1075_v52, %v1432_v0 }
  0x2c   : > { %1351 = vst [vmem:[%s1466_s25 + $0x40] sm:$0xff] %v1196_v54   ;;  %v1206_v1 = vpack.c.bf16 %v465_v56, %v464_v55  ;;  %v467_v2 = vmax.f32 %v403_v57, 0.0  ;;  %v1079_v3 = vunpack.c.l.bf16 %v1325_v53  ;;  %v1080_v4 = vunpack.c.h.bf16 %v1325_v53  ;;  %v1332_v54 = vld [vmem:[%s1427_s18 + $0xa0] sm:$0xff]  }
  0x2d   : > { %1352 = vst [vmem:[%s1466_s25 + $0x48] sm:$0xff] %v1201_v59   ;;  %v334_v5 = vmul.f32 %v1076_v61, %v1432_v0  ;;  %v404_v6 = vadd.f32 %v1441_v9, %v333_v62  ;;  %v1083_v7 = vunpack.c.l.bf16 %v1326_v58  ;;  %v1084_v8 = vunpack.c.h.bf16 %v1326_v58 }
  0x2e   : > { %1353 = vst [vmem:[%s1466_s25 + $0x50] sm:$0xff] %v1206_v1   ;;  %v1211_v10 = vpack.c.bf16 %v467_v2, %v466_v60  ;;  %v335_v11 = vmul.f32 %v1079_v3, %v1432_v0  ;;  %v336_v12 = vmul.f32 %v1080_v4, %v1432_v0  ;;  %v1087_v13 = vunpack.c.l.bf16 %v1327_v63  ;;  %v1333_v4 = vld [vmem:[%s1427_s18 + $0xa8] sm:$0xff]  }
  0x2f   : > { %v405_v15 = vadd.f32 %v1441_v9, %v334_v5  ;;  %v468_v16 = vmax.f32 %v404_v6, 0.0  ;;  %v337_v17 = vmul.f32 %v1083_v7, %v1432_v0  ;;  %v338_v18 = vmul.f32 %v1084_v8, %v1432_v0 }
  0x30   : > { %1354 = vst [vmem:[%s1466_s25 + $0x58] sm:$0xff] %v1211_v10   ;;  %v406_v19 = vadd.f32 %v1441_v9, %v335_v11  ;;  %v407_v20 = vadd.f32 %v1441_v9, %v336_v12  ;;  %v1088_v21 = vunpack.c.h.bf16 %v1327_v63  ;;  %v339_v22 = vmul.f32 %v1087_v13, %v1432_v0 }
  0x31   : > { %v469_v23 = vmax.f32 %v405_v15, 0.0  ;;  %v408_v24 = vadd.f32 %v1441_v9, %v337_v17  ;;  %v409_v25 = vadd.f32 %v1441_v9, %v338_v18  ;;  %v1091_v26 = vunpack.c.l.bf16 %v1328_v14 }
  0x32   : > { %v470_v27 = vmax.f32 %v406_v19, 0.0  ;;  %v471_v28 = vmax.f32 %v407_v20, 0.0  ;;  %v340_v29 = vmul.f32 %v1088_v21, %v1432_v0  ;;  %v410_v30 = vadd.f32 %v1441_v9, %v339_v22  ;;  %v1335_v19 = vld [vmem:[%s1427_s18 + $0xb8] sm:$0xff]  }
  0x33   : > { %v1216_v32 = vpack.c.bf16 %v469_v23, %v468_v16  ;;  %v472_v33 = vmax.f32 %v408_v24, 0.0  ;;  %v473_v34 = vmax.f32 %v409_v25, 0.0  ;;  %v1092_v35 = vunpack.c.h.bf16 %v1328_v14  ;;  %v1334_v14 = vld [vmem:[%s1427_s18 + $0xb0] sm:$0xff]  }
  0x34   : > { %v1221_v37 = vpack.c.bf16 %v471_v28, %v470_v27  ;;  %v411_v38 = vadd.f32 %v1441_v9, %v340_v29  ;;  %v474_v39 = vmax.f32 %v410_v30, 0.0  ;;  %v341_v40 = vmul.f32 %v1091_v26, %v1432_v0 }
  0x35   : > { %1355 = vst [vmem:[%s1466_s25 + $0x60] sm:$0xff] %v1216_v32   ;;  %v1226_v42 = vpack.c.bf16 %v473_v34, %v472_v33  ;;  %v342_v43 = vmul.f32 %v1092_v35, %v1432_v0  ;;  %v1095_v44 = vunpack.c.l.bf16 %v1329_v31  ;;  %v1096_v45 = vunpack.c.h.bf16 %v1329_v31  ;;  %v1336_v32 = vld [vmem:[%s1427_s18 + $0xc0] sm:$0xff]  }
  0x36   : > { %1356 = vst [vmem:[%s1466_s25 + $0x68] sm:$0xff] %v1221_v37   ;;  %v475_v46 = vmax.f32 %v411_v38, 0.0  ;;  %v412_v47 = vadd.f32 %v1441_v9, %v341_v40  ;;  %v1099_v48 = vunpack.c.l.bf16 %v1330_v36  ;;  %v1100_v49 = vunpack.c.h.bf16 %v1330_v36 }
  0x37   : > { %1357 = vst [vmem:[%s1466_s25 + $0x70] sm:$0xff] %v1226_v42   ;;  %v413_v50 = vadd.f32 %v1441_v9, %v342_v43  ;;  %v343_v51 = vmul.f32 %v1095_v44, %v1432_v0  ;;  %v344_v52 = vmul.f32 %v1096_v45, %v1432_v0  ;;  %v1103_v53 = vunpack.c.l.bf16 %v1331_v41  ;;  %v1337_v45 = vld [vmem:[%s1427_s18 + $0xc8] sm:$0xff]  }
  0x38   : > { %v1231_v55 = vpack.c.bf16 %v475_v46, %v474_v39  ;;  %v476_v56 = vmax.f32 %v412_v47, 0.0  ;;  %v345_v57 = vmul.f32 %v1099_v48, %v1432_v0  ;;  %v346_v58 = vmul.f32 %v1100_v49, %v1432_v0 }
  0x39   : > { %v477_v59 = vmax.f32 %v413_v50, 0.0  ;;  %v414_v60 = vadd.f32 %v1441_v9, %v343_v51  ;;  %v415_v61 = vadd.f32 %v1441_v9, %v344_v52  ;;  %v1104_v62 = vunpack.c.h.bf16 %v1331_v41 }
  0x3a   : > { %1358 = vst [vmem:[%s1466_s25 + $0x78] sm:$0xff] %v1231_v55   ;;  %v416_v63 = vadd.f32 %v1441_v9, %v345_v57  ;;  %v417_v1 = vadd.f32 %v1441_v9, %v346_v58  ;;  %v347_v2 = vmul.f32 %v1103_v53, %v1432_v0  ;;  %v1107_v3 = vunpack.c.l.bf16 %v1332_v54 }
  0x3b   : > { %v1236_v5 = vpack.c.bf16 %v477_v59, %v476_v56  ;;  %v478_v6 = vmax.f32 %v414_v60, 0.0  ;;  %v479_v7 = vmax.f32 %v415_v61, 0.0  ;;  %v348_v8 = vmul.f32 %v1104_v62, %v1432_v0 }
  0x3c   : > { %v480_v10 = vmax.f32 %v416_v63, 0.0  ;;  %v481_v11 = vmax.f32 %v417_v1, 0.0  ;;  %v418_v12 = vadd.f32 %v1441_v9, %v347_v2  ;;  %v1108_v13 = vunpack.c.h.bf16 %v1332_v54  ;;  %v1338_v54 = vld [vmem:[%s1427_s18 + $0xd0] sm:$0xff]   ;;  %v1339_v63 = vld [vmem:[%s1427_s18 + $0xd8] sm:$0xff]  }
  0x3d   : > { %1359 = vst [vmem:[%s1466_s25 + $0x80] sm:$0xff] %v1236_v5   ;;  %v1241_v15 = vpack.c.bf16 %v479_v7, %v478_v6  ;;  %v419_v16 = vadd.f32 %v1441_v9, %v348_v8  ;;  %v349_v17 = vmul.f32 %v1107_v3, %v1432_v0  ;;  %v1111_v18 = vunpack.c.l.bf16 %v1333_v4 }
  0x3e   : > { %v1246_v20 = vpack.c.bf16 %v481_v11, %v480_v10  ;;  %v482_v21 = vmax.f32 %v418_v12, 0.0  ;;  %v350_v22 = vmul.f32 %v1108_v13, %v1432_v0  ;;  %v1112_v23 = vunpack.c.h.bf16 %v1333_v4  ;;  %v1340_v10 = vld [vmem:[%s1427_s18 + $0xe0] sm:$0xff]  }
  0x3f   : > { %1360 = vst [vmem:[%s1466_s25 + $0x88] sm:$0xff] %v1241_v15   ;;  %v483_v24 = vmax.f32 %v419_v16, 0.0  ;;  %v420_v25 = vadd.f32 %v1441_v9, %v349_v17  ;;  %v351_v26 = vmul.f32 %v1111_v18, %v1432_v0  ;;  %v1115_v27 = vunpack.c.l.bf16 %v1334_v14 }
  0x40   : > { %1361 = vst [vmem:[%s1466_s25 + $0x90] sm:$0xff] %v1246_v20   ;;  %v421_v28 = vadd.f32 %v1441_v9, %v350_v22  ;;  %v352_v29 = vmul.f32 %v1112_v23, %v1432_v0  ;;  %v1116_v30 = vunpack.c.h.bf16 %v1334_v14  ;;  %v1119_v31 = vunpack.c.l.bf16 %v1335_v19  ;;  %v1341_v23 = vld [vmem:[%s1427_s18 + $0xe8] sm:$0xff]  }
  0x41   : > { %v1251_v33 = vpack.c.bf16 %v483_v24, %v482_v21  ;;  %v484_v34 = vmax.f32 %v420_v25, 0.0  ;;  %v422_v35 = vadd.f32 %v1441_v9, %v351_v26  ;;  %v353_v36 = vmul.f32 %v1115_v27, %v1432_v0 }
  0x42   : > { %v485_v37 = vmax.f32 %v421_v28, 0.0  ;;  %v423_v38 = vadd.f32 %v1441_v9, %v352_v29  ;;  %v354_v39 = vmul.f32 %v1116_v30, %v1432_v0  ;;  %v1120_v40 = vunpack.c.h.bf16 %v1335_v19 }
  0x43   : > { %1362 = vst [vmem:[%s1466_s25 + $0x98] sm:$0xff] %v1251_v33   ;;  %v486_v41 = vmax.f32 %v422_v35, 0.0  ;;  %v424_v42 = vadd.f32 %v1441_v9, %v353_v36  ;;  %v355_v43 = vmul.f32 %v1119_v31, %v1432_v0  ;;  %v1123_v44 = vunpack.c.l.bf16 %v1336_v32 }
  0x44   : > { %v1256_v46 = vpack.c.bf16 %v485_v37, %v484_v34  ;;  %v487_v47 = vmax.f32 %v423_v38, 0.0  ;;  %v425_v48 = vadd.f32 %v1441_v9, %v354_v39  ;;  %v356_v49 = vmul.f32 %v1120_v40, %v1432_v0 }
  0x45   : > { %v488_v50 = vmax.f32 %v424_v42, 0.0  ;;  %v426_v51 = vadd.f32 %v1441_v9, %v355_v43  ;;  %v1124_v52 = vunpack.c.h.bf16 %v1336_v32  ;;  %v357_v53 = vmul.f32 %v1123_v44, %v1432_v0  ;;  %v1342_v32 = vld [vmem:[%s1427_s18 + $0xf0] sm:$0xff]  }
  0x46   : > { %1363 = vst [vmem:[%s1466_s25 + $0xa0] sm:$0xff] %v1256_v46   ;;  %v1261_v55 = vpack.c.bf16 %v487_v47, %v486_v41  ;;  %v489_v56 = vmax.f32 %v425_v48, 0.0  ;;  %v427_v57 = vadd.f32 %v1441_v9, %v356_v49  ;;  %v1127_v58 = vunpack.c.l.bf16 %v1337_v45  ;;  %v1343_v41 = vld [vmem:[%s1427_s18 + $0xf8] sm:$0xff]  }
  0x47   : > { %v490_v59 = vmax.f32 %v426_v51, 0.0  ;;  %v358_v60 = vmul.f32 %v1124_v52, %v1432_v0  ;;  %v428_v61 = vadd.f32 %v1441_v9, %v357_v53  ;;  %v1128_v62 = vunpack.c.h.bf16 %v1337_v45 }
  0x48   : > { %1364 = vst [vmem:[%s1466_s25 + $0xa8] sm:$0xff] %v1261_v55   ;;  %v1266_v1 = vpack.c.bf16 %v489_v56, %v488_v50  ;;  %v491_v2 = vmax.f32 %v427_v57, 0.0  ;;  %v359_v3 = vmul.f32 %v1127_v58, %v1432_v0  ;;  %v1131_v4 = vunpack.c.l.bf16 %v1338_v54 }
  0x49   : > { %v429_v5 = vadd.f32 %v1441_v9, %v358_v60  ;;  %v492_v6 = vmax.f32 %v428_v61, 0.0  ;;  %v360_v7 = vmul.f32 %v1128_v62, %v1432_v0  ;;  %v1132_v8 = vunpack.c.h.bf16 %v1338_v54 }
  0x4a   : > { %1365 = vst [vmem:[%s1466_s25 + $0xb0] sm:$0xff] %v1266_v1   ;;  %v1271_v11 = vpack.c.bf16 %v491_v2, %v490_v59  ;;  %v430_v12 = vadd.f32 %v1441_v9, %v359_v3  ;;  %v361_v13 = vmul.f32 %v1131_v4, %v1432_v0  ;;  %v1135_v14 = vunpack.c.l.bf16 %v1339_v63 }
  0x4b   : > { %v493_v15 = vmax.f32 %v429_v5, 0.0  ;;  %v431_v16 = vadd.f32 %v1441_v9, %v360_v7  ;;  %v362_v17 = vmul.f32 %v1132_v8, %v1432_v0  ;;  %v1136_v18 = vunpack.c.h.bf16 %v1339_v63 }
  0x4c   : > { %1366 = vst [vmem:[%s1466_s25 + $0xb8] sm:$0xff] %v1271_v11   ;;  %v494_v19 = vmax.f32 %v430_v12, 0.0  ;;  %v432_v20 = vadd.f32 %v1441_v9, %v361_v13  ;;  %v363_v21 = vmul.f32 %v1135_v14, %v1432_v0  ;;  %v1139_v22 = vunpack.c.l.bf16 %v1340_v10 }
  0x4d   : > { %v1276_v24 = vpack.c.bf16 %v493_v15, %v492_v6  ;;  %v495_v25 = vmax.f32 %v431_v16, 0.0  ;;  %v433_v26 = vadd.f32 %v1441_v9, %v362_v17  ;;  %v364_v27 = vmul.f32 %v1136_v18, %v1432_v0 }
  0x4e   : > { %v496_v28 = vmax.f32 %v432_v20, 0.0  ;;  %v434_v29 = vadd.f32 %v1441_v9, %v363_v21  ;;  %v1140_v30 = vunpack.c.h.bf16 %v1340_v10  ;;  %v365_v31 = vmul.f32 %v1139_v22, %v1432_v0 }
  0x4f   : > { %1367 = vst [vmem:[%s1466_s25 + $0xc0] sm:$0xff] %v1276_v24   ;;  %v1281_v33 = vpack.c.bf16 %v495_v25, %v494_v19  ;;  %v497_v34 = vmax.f32 %v433_v26, 0.0  ;;  %v435_v35 = vadd.f32 %v1441_v9, %v364_v27  ;;  %v1143_v36 = vunpack.c.l.bf16 %v1341_v23 }
  0x50   : > { %v498_v37 = vmax.f32 %v434_v29, 0.0  ;;  %v366_v38 = vmul.f32 %v1140_v30, %v1432_v0  ;;  %v436_v39 = vadd.f32 %v1441_v9, %v365_v31  ;;  %v1144_v40 = vunpack.c.h.bf16 %v1341_v23 }
  0x51   : > { %1368 = vst [vmem:[%s1466_s25 + $0xc8] sm:$0xff] %v1281_v33   ;;  %v1286_v42 = vpack.c.bf16 %v497_v34, %v496_v28  ;;  %v499_v43 = vmax.f32 %v435_v35, 0.0  ;;  %v367_v44 = vmul.f32 %v1143_v36, %v1432_v0  ;;  %v1147_v45 = vunpack.c.l.bf16 %v1342_v32 }
  0x52   : > { %v437_v46 = vadd.f32 %v1441_v9, %v366_v38  ;;  %v500_v47 = vmax.f32 %v436_v39, 0.0  ;;  %v368_v48 = vmul.f32 %v1144_v40, %v1432_v0  ;;  %v1148_v49 = vunpack.c.h.bf16 %v1342_v32 }
  0x53   : > { %1369 = vst [vmem:[%s1466_s25 + $0xd0] sm:$0xff] %v1286_v42   ;;  %v1291_v50 = vpack.c.bf16 %v499_v43, %v498_v37  ;;  %v438_v51 = vadd.f32 %v1441_v9, %v367_v44  ;;  %v369_v52 = vmul.f32 %v1147_v45, %v1432_v0  ;;  %v1151_v53 = vunpack.c.l.bf16 %v1343_v41 }
  0x54   : > { %v501_v54 = vmax.f32 %v437_v46, 0.0  ;;  %v439_v55 = vadd.f32 %v1441_v9, %v368_v48  ;;  %v370_v56 = vmul.f32 %v1148_v49, %v1432_v0  ;;  %v1152_v57 = vunpack.c.h.bf16 %v1343_v41 }
  0x55   : > { %1370 = vst [vmem:[%s1466_s25 + $0xd8] sm:$0xff] %v1291_v50   ;;  %v502_v58 = vmax.f32 %v438_v51, 0.0  ;;  %v440_v59 = vadd.f32 %v1441_v9, %v369_v52  ;;  %v371_v60 = vmul.f32 %v1151_v53, %v1432_v0 }
  0x56   : > { %v1296_v61 = vpack.c.bf16 %v501_v54, %v500_v47  ;;  %v503_v62 = vmax.f32 %v439_v55, 0.0  ;;  %v441_v63 = vadd.f32 %v1441_v9, %v370_v56  ;;  %v372_v1 = vmul.f32 %v1152_v57, %v1432_v0 }
  0x57   : > { %v504_v2 = vmax.f32 %v440_v59, 0.0  ;;  %v442_v3 = vadd.f32 %v1441_v9, %v371_v60 }
  0x58   : > { %1371 = vst [vmem:[%s1466_s25 + $0xe0] sm:$0xff] %v1296_v61   ;;  %v1301_v4 = vpack.c.bf16 %v503_v62, %v502_v58  ;;  %v505_v5 = vmax.f32 %v441_v63, 0.0  ;;  %v443_v6 = vadd.f32 %v1441_v9, %v372_v1 }
  0x59   : > { %v506_v7 = vmax.f32 %v442_v3, 0.0 }
  0x5a   : > { %1372 = vst [vmem:[%s1466_s25 + $0xe8] sm:$0xff] %v1301_v4   ;;  %v1306_v8 = vpack.c.bf16 %v505_v5, %v504_v2  ;;  %v507_v10 = vmax.f32 %v443_v6, 0.0 }
  0x5c   : > { %1373 = vst [vmem:[%s1466_s25 + $0xf0] sm:$0xff] %v1306_v8   ;;  %v1311_v11 = vpack.c.bf16 %v507_v10, %v506_v7 }
  0x5e   : > { %1374 = vst [vmem:[%s1466_s25 + $0xf8] sm:$0xff] %v1311_v11  }
  0x5f PF: > { %s13_s12 = sadd.s32 1, %s1389_s12  }
  0x60   : > { %p10_p4 = scmp.ge.s32.totalorder %s13_s12, 4  }
  0x62   :  { %12 = sbr.rel (!%p10_p4) target bundleno = 1 (0x1), region = 62 }

// kernel: _stem_forward.2
= control target key start
LH: loop header
LB: loop body
LE: loop exit
PB: predicated region body
PF: predicated region fallthrough
CT: control target
= control target key end

     0   :  { %s1888_s15 = smov 0   ;;  %s1890_s16 = smov 0   ;;  %s2120_s0 = inlined_call_operand.vmem [shape: bf16[1024,256], index: 0, kind: input, shape index: {}]   ;;  %s2121_s1 = inlined_call_operand.vmem [shape: bf16[256,128], index: 1, kind: input, shape index: {}]   ;;  %s2122_s2 = inlined_call_operand.vmem [shape: bf16[1024,128], index: 2, kind: output, shape index: {0}]   ;;  %s2123_s3 = inlined_call_operand.vmem [shape: f32[4,1,128], index: 3, kind: output, shape index: {1}]   ;;  %s2124_s4 = inlined_call_operand.vmem [shape: f32[4,1,128], index: 4, kind: output, shape index: {2}]  }
   0x1   :  { %s1892_s17 = smov 0  }
   0x2 LB: > { %s34_s18 = sadd.s32 1, %s1857_s16  ;;  %p1407_p0 = scmp.ge.s32.totalorder %s1861_s17, 1  ;;  %s1861_s17 = sphi %s1892_s17, %s15_s17   ;;  %s1857_s16 = sphi %s1890_s16, %s2126_s16   ;;  %s1853_s15 = sphi %s1888_s15, %s2125_s15  }
   0x3   : > { %p36_p1 = scmp.ge.s32.totalorder %s34_s18, 4  ;;  %p217_p2 = scmp.lt.s32.totalorder %s1861_s17, 5 }
   0x5   : > { %s2128_s18 = smov (%p36_p1, %s34_s18), 0  ;;  %p218_p3 = pnand %p1407_p0, %p217_p2 }
   0x6   : > { %v1775_v0 = vld [vmem:[%s2121_s1 + $0x40] sm:$0xff] (!%p218_p3)   ;;  %s1408_s21 = sshll.u32 (!%p218_p3), %s1853_s15, 5  ;;  %v1777_v2 = vld [vmem:[%s2121_s1 + $0x48] sm:$0xff] (!%p218_p3)   ;;  %v1779_v4 = vld [vmem:[%s2121_s1 + $0x50] sm:$0xff] (!%p218_p3)   ;;  %p301_p5 = scmp.lt.s32.totalorder (!%p218_p3), %s1853_s15, 3 }
   0x7   : > { %221 = sbr.rel (%p218_p3) target bundleno = 361 (0x169), region = 28  ;;  %v1776_v1 = vld [vmem:[%s2121_s1] sm:$0xff] (!%p218_p3)   ;;  %1623 = vmatprep.subr.bf16.mxu0 (!%p218_p3), %v1775_v0  ;;  %1735 = vmatprep.subr.bf16.mxu1 (!%p218_p3), %v1775_v0  ;;  %v1778_v3 = vld [vmem:[%s2121_s1 + $0x8] sm:$0xff] (!%p218_p3)   ;;  %p273_p4 = scmp.lt.s32.totalorder (!%p218_p3), %s1408_s21, 127  ;;  %v1780_v5 = vld [vmem:[%s2121_s1 + $0x10] sm:$0xff] (!%p218_p3)  }
   0x8   : > { %1624 = vmatpush3.bf16.msra.mxu0 (!%p218_p3), %v1776_v1  ;;  %1743 = vmatpush3.bf16.msra.mxu1 (!%p218_p3), %v1776_v1  ;;  %v1781_v6 = vld [vmem:[%s2121_s1 + $0x58] sm:$0xff] (!%p218_p3)   ;;  %v1783_v8 = vld [vmem:[%s2121_s1 + $0x60] sm:$0xff] (!%p218_p3)   ;;  %v1785_v10 = vld [vmem:[%s2121_s1 + $0x68] sm:$0xff] (!%p218_p3)  }
   0x9   : > { %1625 = vmatprep.subr.bf16.mxu0 (!%p218_p3), %v1777_v2  ;;  %1736 = vmatprep.subr.bf16.mxu1 (!%p218_p3), %v1777_v2  ;;  %v1782_v7 = vld [vmem:[%s2121_s1 + $0x18] sm:$0xff] (!%p218_p3)   ;;  %v1784_v9 = vld [vmem:[%s2121_s1 + $0x20] sm:$0xff] (!%p218_p3)   ;;  %v1786_v12 = vld [vmem:[%s2121_s1 + $0x28] sm:$0xff] (!%p218_p3)  }
   0xa   : > { %v1787_v13 = vld [vmem:[%s2121_s1 + $0x70] sm:$0xff] (!%p218_p3)   ;;  %v1789_v16 = vld [vmem:[%s2121_s1 + $0x78] sm:$0xff] (!%p218_p3)  }
   0xb   : > { %v1788_v15 = vld [vmem:[%s2121_s1 + $0x30] sm:$0xff] (!%p218_p3)   ;;  %v1790_v17 = vld [vmem:[%s2121_s1 + $0x38] sm:$0xff] (!%p218_p3)  }
   0xc   : > { %1626 = vmatpush3.bf16.msra.mxu0 (!%p218_p3), %v1778_v3  ;;  %1744 = vmatpush3.bf16.msra.mxu1 (!%p218_p3), %v1778_v3 }
   0xd   : > { %1627 = vmatprep.subr.bf16.mxu0 (!%p218_p3), %v1779_v4  ;;  %1737 = vmatprep.subr.bf16.mxu1 (!%p218_p3), %v1779_v4 }
   0xe   : > { %s2130_s21 = smov (!%p273_p4, %s1408_s21), 127  ;;  %s2132_s15 = smov (!%p301_p5, %s1853_s15), 3 }
   0xf   : > { %s1495_s10 = sshll.u32 %s2130_s21, 3  ;;  %s1412_s9 = sshll.u32 %s2130_s21, 2 }
  0x10   : > { %1628 = vmatpush3.bf16.msra.mxu0 %v1780_v5  ;;  %1745 = vmatpush3.bf16.msra.mxu1 %v1780_v5  ;;  %s1942_s19 = scalar_lea.vmem %s2120_s0, %s1495_s10  ;;  %s2003_s12 = scalar_lea.vmem %s2122_s2, %s1412_s9 }
  0x11   : > { %1629 = vmatprep.subr.bf16.mxu0 %v1781_v6  ;;  %1738 = vmatprep.subr.bf16.mxu1 %v1781_v6  ;;  %v1793_v11 = vld [vmem:[%s1942_s19 + $0x4] ss:$8 sps:$4 sm:$0xff]   ;;  %v1791_v18 = vld [vmem:[%s1942_s19] ss:$8 sps:$4 sm:$0xff]   ;;  %v1794_v19 = vld [vmem:[%s1942_s19 + $0x14] ss:$8 sps:$4 sm:$0xff]   ;;  %s306_s14 = scalar_lea.vmem %s2123_s3, %s2132_s15  ;;  %s312_s22 = scalar_lea.vmem %s2124_s4, %s2132_s15 }
  0x12   : > { %734 = vmatprep.mubr.bf16.mxu0 %v1793_v11  ;;  %v1805_v14 = vld [vmem:[%s1942_s19 + $0x84] ss:$8 sps:$4 sm:$0xff]   ;;  %v1803_v20 = vld [vmem:[%s1942_s19 + $0x80] ss:$8 sps:$4 sm:$0xff]   ;;  %v1809_v21 = vld [vmem:[%s1942_s19 + $0x94] ss:$8 sps:$4 sm:$0xff]  }
  0x13   : > { %798 = vmatprep.mubr.bf16.mxu1 %v1805_v14  ;;  %v1796_v22 = vld [vmem:[%s1942_s19 + $0x10] ss:$8 sps:$4 sm:$0xff]   ;;  %v1797_v23 = vld [vmem:[%s1942_s19 + $0x24] ss:$8 sps:$4 sm:$0xff]   ;;  %v1799_v26 = vld [vmem:[%s1942_s19 + $0x20] ss:$8 sps:$4 sm:$0xff]  }
  0x14   : > { %1630 = vmatpush3.bf16.msra.mxu0 %v1782_v7  ;;  %1746 = vmatpush3.bf16.msra.mxu1 %v1782_v7  ;;  %v1811_v24 = vld [vmem:[%s1942_s19 + $0x90] ss:$8 sps:$4 sm:$0xff]   ;;  %v1815_v25 = vld [vmem:[%s1942_s19 + $0xa4] ss:$8 sps:$4 sm:$0xff]   ;;  %v1800_v27 = vld [vmem:[%s1942_s19 + $0x34] ss:$8 sps:$4 sm:$0xff]  }
  0x15   : > { %1631 = vmatprep.subr.bf16.mxu0 %v1783_v8  ;;  %1739 = vmatprep.subr.bf16.mxu1 %v1783_v8  ;;  %v1817_v28 = vld [vmem:[%s1942_s19 + $0xa0] ss:$8 sps:$4 sm:$0xff]   ;;  %v1821_v29 = vld [vmem:[%s1942_s19 + $0xb4] ss:$8 sps:$4 sm:$0xff]   ;;  %v1802_v30 = vld [vmem:[%s1942_s19 + $0x30] ss:$8 sps:$4 sm:$0xff]  }
  0x16   : > { %v1806_v31 = vld [vmem:[%s1942_s19 + $0x44] ss:$8 sps:$4 sm:$0xff]   ;;  %v1823_v32 = vld [vmem:[%s1942_s19 + $0xb0] ss:$8 sps:$4 sm:$0xff]   ;;  %v1808_v34 = vld [vmem:[%s1942_s19 + $0x40] ss:$8 sps:$4 sm:$0xff]  }
  0x17   : > { %v1827_v33 = vld [vmem:[%s1942_s19 + $0xc4] ss:$8 sps:$4 sm:$0xff]   ;;  %v1812_v35 = vld [vmem:[%s1942_s19 + $0x54] ss:$8 sps:$4 sm:$0xff]   ;;  %v1829_v36 = vld [vmem:[%s1942_s19 + $0xc0] ss:$8 sps:$4 sm:$0xff]  }
  0x18   : > { %1632 = vmatpush3.bf16.msra.mxu0 %v1784_v9  ;;  %1747 = vmatpush3.bf16.msra.mxu1 %v1784_v9  ;;  %v1830_v37 = vld [vmem:[%s1942_s19 + $0xd4] ss:$8 sps:$4 sm:$0xff]   ;;  %v1814_v38 = vld [vmem:[%s1942_s19 + $0x50] ss:$8 sps:$4 sm:$0xff]   ;;  %v1818_v39 = vld [vmem:[%s1942_s19 + $0x64] ss:$8 sps:$4 sm:$0xff]  }
  0x19   : > { %1633 = vmatprep.subr.bf16.mxu0 %v1785_v10  ;;  %1740 = vmatprep.subr.bf16.mxu1 %v1785_v10  ;;  %v1832_v40 = vld [vmem:[%s1942_s19 + $0xd0] ss:$8 sps:$4 sm:$0xff]   ;;  %v1833_v41 = vld [vmem:[%s1942_s19 + $0xe4] ss:$8 sps:$4 sm:$0xff]   ;;  %v1820_v42 = vld [vmem:[%s1942_s19 + $0x60] ss:$8 sps:$4 sm:$0xff]  }
  0x1a   : > { %v1824_v43 = vld [vmem:[%s1942_s19 + $0x74] ss:$8 sps:$4 sm:$0xff]   ;;  %v1835_v44 = vld [vmem:[%s1942_s19 + $0xe0] ss:$8 sps:$4 sm:$0xff]   ;;  %v1826_v46 = vld [vmem:[%s1942_s19 + $0x70] ss:$8 sps:$4 sm:$0xff]  }
  0x1b   : > { %v1836_v45 = vld [vmem:[%s1942_s19 + $0xf4] ss:$8 sps:$4 sm:$0xff]   ;;  %v1838_v47 = vld [vmem:[%s1942_s19 + $0xf0] ss:$8 sps:$4 sm:$0xff]  }
  0x1c   : > { %1634 = vmatpush3.bf16.msra.mxu0 %v1786_v12  ;;  %1748 = vmatpush3.bf16.msra.mxu1 %v1786_v12 }
  0x1d   : > { %1635 = vmatprep.subr.bf16.mxu0 %v1787_v13  ;;  %1741 = vmatprep.subr.bf16.mxu1 %v1787_v13 }
  0x20   : > { %1636 = vmatpush3.bf16.msra.mxu0 %v1788_v15  ;;  %1749 = vmatpush3.bf16.msra.mxu1 %v1788_v15 }
  0x21   : > { %1637 = vmatprep.subr.bf16.mxu0 %v1789_v16  ;;  %1742 = vmatprep.subr.bf16.mxu1 %v1789_v16 }
  0x24   : > { %1638 = vmatpush3.bf16.msra.mxu0 %v1790_v17  ;;  %1750 = vmatpush3.bf16.msra.mxu1 %v1790_v17 }
  0x27   : > { %735 = vmatmul.mubr.bf16.vlgmr.msra.gmra.mrb[0].mxu0 %v1791_v18  ;;  %799 = vmatmul.mubr.bf16.vlgmr.msra.gmra.mrb[0].mxu1 %v1803_v20 }
  0x28   : > { %742 = vmatprep.mubr.bf16.mxu0 %v1794_v19  ;;  %806 = vmatprep.mubr.bf16.mxu1 %v1809_v21 }
  0x2f   : > { %743 = vmatmul.mubr.bf16.gmra.mrb[4].mxu0 %v1796_v22  ;;  %807 = vmatmul.mubr.bf16.gmra.mrb[4].mxu1 %v1811_v24 }
  0x30   : > { %750 = vmatprep.mubr.bf16.mxu0 %v1797_v23  ;;  %814 = vmatprep.mubr.bf16.mxu1 %v1815_v25 }
  0x37   : > { %751 = vmatmul.mubr.bf16.gmra.mrb[8].mxu0 %v1799_v26  ;;  %815 = vmatmul.mubr.bf16.gmra.mrb[8].mxu1 %v1817_v28 }
  0x38   : > { %758 = vmatprep.mubr.bf16.mxu0 %v1800_v27  ;;  %822 = vmatprep.mubr.bf16.mxu1 %v1821_v29 }
  0x3f   : > { %759 = vmatmul.mubr.bf16.gmra.mrb[12].mxu0 %v1802_v30  ;;  %823 = vmatmul.mubr.bf16.gmra.mrb[12].mxu1 %v1823_v32 }
  0x40   : > { %766 = vmatprep.mubr.bf16.mxu0 %v1806_v31  ;;  %830 = vmatprep.mubr.bf16.mxu1 %v1827_v33 }
  0x47   : > { %767 = vmatmul.mubr.bf16.gmra.mrb[16].mxu0 %v1808_v34  ;;  %831 = vmatmul.mubr.bf16.gmra.mrb[16].mxu1 %v1829_v36 }
  0x48   : > { %774 = vmatprep.mubr.bf16.mxu0 %v1812_v35  ;;  %838 = vmatprep.mubr.bf16.mxu1 %v1830_v37 }
  0x4f   : > { %775 = vmatmul.mubr.bf16.gmra.mrb[20].mxu0 %v1814_v38  ;;  %839 = vmatmul.mubr.bf16.gmra.mrb[20].mxu1 %v1832_v40 }
  0x50   : > { %782 = vmatprep.mubr.bf16.mxu0 %v1818_v39  ;;  %846 = vmatprep.mubr.bf16.mxu1 %v1833_v41 }
  0x57   : > { %783 = vmatmul.mubr.bf16.gmra.mrb[24].mxu0 %v1820_v42  ;;  %847 = vmatmul.mubr.bf16.gmra.mrb[24].mxu1 %v1835_v44 }
  0x58   : > { %790 = vmatprep.mubr.bf16.mxu0 %v1824_v43  ;;  %854 = vmatprep.mubr.bf16.mxu1 %v1836_v45 }
  0x5f   : > { %791 = vmatmul.mubr.bf16.gmra.mrb[28].mxu0 %v1826_v46  ;;  %855 = vmatmul.mubr.bf16.gmra.mrb[28].mxu1 %v1838_v47 }
  0xfa   : > { %v1639_v48 = vpop.f32.mrb[0].mxu0  ;;  %v1687_v50 = vpop.f32.mrb[0].mxu1 }
  0xfb   : > { %v1640_v49 = vpop.f32.mrb[1].mxu0  ;;  %v1688_v53 = vpop.f32.mrb[1].mxu1 }
  0xfc   : > { %v1641_v51 = vadd.f32 %v1640_v49, %v1639_v48  ;;  %v1642_v52 = vpop.f32.mrb[2].mxu0  ;;  %v1998_v55 = vadd.f32 %v1688_v53, %v1687_v50  ;;  %v1690_v56 = vpop.f32.mrb[2].mxu1 }
  0xfd   : > { %v1643_v54 = vpop.f32.mrb[3].mxu0  ;;  %v1691_v58 = vpop.f32.mrb[3].mxu1 }
  0xfe   : > { %v1644_v57 = vadd.f32 %v1643_v54, %v1642_v52  ;;  %v2005_v59 = vadd.f32 %v1691_v58, %v1690_v56  ;;  %v1160_v60 = vmul.f32 %v1641_v51, %v1641_v51 }
 0x100   : > { %v1531_v61 = vpack.c.bf16 %v1644_v57, %v1641_v51  ;;  %v1122_v62 = vadd.f32 %v1644_v57, %v1641_v51  ;;  %v1161_v63 = vmul.f32 %v1644_v57, %v1644_v57  ;;  %v1571_v0 = vpack.c.bf16 %v2005_v59, %v1998_v55 }
 0x102   : > { %1532 = vst [vmem:[%s2003_s12] sm:$0xff] %v1531_v61   ;;  %v1192_v1 = vadd.f32 %v1161_v63, %v1160_v60  ;;  %v1645_v2 = vpop.f32.mrb[4].mxu0  ;;  %1615 = vst [vmem:[%s2003_s12 + $0x40] sm:$0xff] %v1571_v0   ;;  %v1693_v4 = vpop.f32.mrb[4].mxu1 }
 0x103   : > { %v1646_v3 = vpop.f32.mrb[5].mxu0  ;;  %v1694_v7 = vpop.f32.mrb[5].mxu1 }
 0x104   : > { %v1647_v5 = vadd.f32 %v1646_v3, %v1645_v2  ;;  %v1648_v6 = vpop.f32.mrb[6].mxu0  ;;  %v2011_v9 = vadd.f32 %v1694_v7, %v1693_v4  ;;  %v1696_v10 = vpop.f32.mrb[6].mxu1 }
 0x105   : > { %v1649_v8 = vpop.f32.mrb[7].mxu0  ;;  %v1697_v14 = vpop.f32.mrb[7].mxu1 }
 0x106   : > { %v1123_v11 = vadd.f32 %v1647_v5, %v1122_v62  ;;  %v1162_v12 = vmul.f32 %v1647_v5, %v1647_v5  ;;  %v1650_v13 = vadd.f32 %v1649_v8, %v1648_v6  ;;  %v2013_v15 = vadd.f32 %v1697_v14, %v1696_v10 }
 0x108   : > { %v1193_v16 = vadd.f32 %v1192_v1, %v1162_v12  ;;  %v1536_v17 = vpack.c.bf16 %v1650_v13, %v1647_v5  ;;  %v1124_v18 = vadd.f32 %v1650_v13, %v1123_v11  ;;  %v1163_v19 = vmul.f32 %v1650_v13, %v1650_v13 }
 0x109   : > { %v1576_v20 = vpack.c.bf16 %v2013_v15, %v2011_v9 }
 0x10a   : > { %1608 = vst [vmem:[%s2003_s12 + $0x8] sm:$0xff] %v1536_v17   ;;  %v1194_v21 = vadd.f32 %v1193_v16, %v1163_v19  ;;  %v1651_v22 = vpop.f32.mrb[8].mxu0  ;;  %v1699_v24 = vpop.f32.mrb[8].mxu1 }
 0x10b   : > { %v1652_v23 = vpop.f32.mrb[9].mxu0  ;;  %1616 = vst [vmem:[%s2003_s12 + $0x48] sm:$0xff] %v1576_v20   ;;  %v1700_v27 = vpop.f32.mrb[9].mxu1 }
 0x10c   : > { %v1653_v25 = vadd.f32 %v1652_v23, %v1651_v22  ;;  %v1654_v26 = vpop.f32.mrb[10].mxu0  ;;  %v2019_v29 = vadd.f32 %v1700_v27, %v1699_v24  ;;  %v1702_v30 = vpop.f32.mrb[10].mxu1 }
 0x10d   : > { %v1655_v28 = vpop.f32.mrb[11].mxu0  ;;  %v1703_v34 = vpop.f32.mrb[11].mxu1 }
 0x10e   : > { %v1125_v31 = vadd.f32 %v1653_v25, %v1124_v18  ;;  %v1164_v32 = vmul.f32 %v1653_v25, %v1653_v25  ;;  %v1656_v33 = vadd.f32 %v1655_v28, %v1654_v26  ;;  %v2021_v35 = vadd.f32 %v1703_v34, %v1702_v30 }
 0x110   : > { %v1195_v36 = vadd.f32 %v1194_v21, %v1164_v32  ;;  %v1541_v37 = vpack.c.bf16 %v1656_v33, %v1653_v25  ;;  %v1126_v38 = vadd.f32 %v1656_v33, %v1125_v31  ;;  %v1165_v39 = vmul.f32 %v1656_v33, %v1656_v33 }
 0x111   : > { %v1581_v40 = vpack.c.bf16 %v2021_v35, %v2019_v29 }
 0x112   : > { %1609 = vst [vmem:[%s2003_s12 + $0x10] sm:$0xff] %v1541_v37   ;;  %v1196_v41 = vadd.f32 %v1195_v36, %v1165_v39  ;;  %v1657_v42 = vpop.f32.mrb[12].mxu0  ;;  %v1705_v44 = vpop.f32.mrb[12].mxu1 }
 0x113   : > { %v1658_v43 = vpop.f32.mrb[13].mxu0  ;;  %1617 = vst [vmem:[%s2003_s12 + $0x50] sm:$0xff] %v1581_v40   ;;  %v1706_v47 = vpop.f32.mrb[13].mxu1 }
 0x114   : > { %v1659_v45 = vadd.f32 %v1658_v43, %v1657_v42  ;;  %v1660_v46 = vpop.f32.mrb[14].mxu0  ;;  %v2027_v49 = vadd.f32 %v1706_v47, %v1705_v44  ;;  %v1708_v50 = vpop.f32.mrb[14].mxu1 }
 0x115   : > { %v1661_v48 = vpop.f32.mrb[15].mxu0  ;;  %v1709_v54 = vpop.f32.mrb[15].mxu1 }
 0x116   : > { %v1127_v51 = vadd.f32 %v1659_v45, %v1126_v38  ;;  %v1166_v52 = vmul.f32 %v1659_v45, %v1659_v45  ;;  %v1662_v53 = vadd.f32 %v1661_v48, %v1660_v46  ;;  %v2029_v56 = vadd.f32 %v1709_v54, %v1708_v50 }
 0x118   : > { %v1197_v57 = vadd.f32 %v1196_v41, %v1166_v52  ;;  %v1546_v58 = vpack.c.bf16 %v1662_v53, %v1659_v45  ;;  %v1128_v60 = vadd.f32 %v1662_v53, %v1127_v51  ;;  %v1167_v61 = vmul.f32 %v1662_v53, %v1662_v53 }
 0x119   : > { %v1586_v62 = vpack.c.bf16 %v2029_v56, %v2027_v49 }
 0x11a   : > { %1610 = vst [vmem:[%s2003_s12 + $0x18] sm:$0xff] %v1546_v58   ;;  %v1198_v63 = vadd.f32 %v1197_v57, %v1167_v61  ;;  %v1663_v0 = vpop.f32.mrb[16].mxu0  ;;  %v1711_v2 = vpop.f32.mrb[16].mxu1 }
 0x11b   : > { %v1664_v1 = vpop.f32.mrb[17].mxu0  ;;  %1618 = vst [vmem:[%s2003_s12 + $0x58] sm:$0xff] %v1586_v62   ;;  %v1712_v5 = vpop.f32.mrb[17].mxu1 }
 0x11c   : > { %v1665_v3 = vadd.f32 %v1664_v1, %v1663_v0  ;;  %v1666_v4 = vpop.f32.mrb[18].mxu0  ;;  %v2035_v7 = vadd.f32 %v1712_v5, %v1711_v2  ;;  %v1714_v8 = vpop.f32.mrb[18].mxu1 }
 0x11d   : > { %v1667_v6 = vpop.f32.mrb[19].mxu0  ;;  %v1715_v13 = vpop.f32.mrb[19].mxu1 }
 0x11e   : > { %v1129_v10 = vadd.f32 %v1665_v3, %v1128_v60  ;;  %v1168_v11 = vmul.f32 %v1665_v3, %v1665_v3  ;;  %v1668_v12 = vadd.f32 %v1667_v6, %v1666_v4  ;;  %v2037_v14 = vadd.f32 %v1715_v13, %v1714_v8 }
 0x120   : > { %v1199_v16 = vadd.f32 %v1198_v63, %v1168_v11  ;;  %v1551_v17 = vpack.c.bf16 %v1668_v12, %v1665_v3  ;;  %v1130_v18 = vadd.f32 %v1668_v12, %v1129_v10  ;;  %v1169_v19 = vmul.f32 %v1668_v12, %v1668_v12 }
 0x121   : > { %v1591_v20 = vpack.c.bf16 %v2037_v14, %v2035_v7 }
 0x122   : > { %1611 = vst [vmem:[%s2003_s12 + $0x20] sm:$0xff] %v1551_v17   ;;  %v1200_v21 = vadd.f32 %v1199_v16, %v1169_v19  ;;  %v1669_v22 = vpop.f32.mrb[20].mxu0  ;;  %v1717_v24 = vpop.f32.mrb[20].mxu1 }
 0x123   : > { %v1670_v23 = vpop.f32.mrb[21].mxu0  ;;  %1619 = vst [vmem:[%s2003_s12 + $0x60] sm:$0xff] %v1591_v20   ;;  %v1718_v27 = vpop.f32.mrb[21].mxu1 }
 0x124   : > { %v1671_v25 = vadd.f32 %v1670_v23, %v1669_v22  ;;  %v1672_v26 = vpop.f32.mrb[22].mxu0  ;;  %v2043_v30 = vadd.f32 %v1718_v27, %v1717_v24  ;;  %v1720_v31 = vpop.f32.mrb[22].mxu1  ;;  %v1176_v27 = vmul.f32 %v1998_v55, %v1998_v55 }
 0x125   : > { %v1673_v28 = vpop.f32.mrb[23].mxu0  ;;  %v1721_v36 = vpop.f32.mrb[23].mxu1 }
 0x126   : > { %v1131_v32 = vadd.f32 %v1671_v25, %v1130_v18  ;;  %v1170_v33 = vmul.f32 %v1671_v25, %v1671_v25  ;;  %v1674_v34 = vadd.f32 %v1673_v28, %v1672_v26  ;;  %v2045_v37 = vadd.f32 %v1721_v36, %v1720_v31 }
 0x127   : > { %v1178_v36 = vmul.f32 %v2011_v9, %v2011_v9 }
 0x128   : > { %v1201_v38 = vadd.f32 %v1200_v21, %v1170_v33  ;;  %v1556_v39 = vpack.c.bf16 %v1674_v34, %v1671_v25  ;;  %v1132_v40 = vadd.f32 %v1674_v34, %v1131_v32  ;;  %v1171_v41 = vmul.f32 %v1674_v34, %v1674_v34 }
 0x129   : > { %v1596_v42 = vpack.c.bf16 %v2045_v37, %v2043_v30  ;;  %v1177_v32 = vmul.f32 %v2005_v59, %v2005_v59 }
 0x12a   : > { %1612 = vst [vmem:[%s2003_s12 + $0x28] sm:$0xff] %v1556_v39   ;;  %v1202_v43 = vadd.f32 %v1201_v38, %v1171_v41  ;;  %v1675_v44 = vpop.f32.mrb[24].mxu0  ;;  %v1723_v46 = vpop.f32.mrb[24].mxu1 }
 0x12b   : > { %v1676_v45 = vpop.f32.mrb[25].mxu0  ;;  %1620 = vst [vmem:[%s2003_s12 + $0x68] sm:$0xff] %v1596_v42   ;;  %v1724_v50 = vpop.f32.mrb[25].mxu1  ;;  %v1180_v42 = vmul.f32 %v2019_v29, %v2019_v29 }
 0x12c   : > { %v1677_v47 = vadd.f32 %v1676_v45, %v1675_v44  ;;  %v1678_v48 = vpop.f32.mrb[26].mxu0  ;;  %v2051_v52 = vadd.f32 %v1724_v50, %v1723_v46  ;;  %v1726_v53 = vpop.f32.mrb[26].mxu1 }
 0x12d   : > { %v1679_v51 = vpop.f32.mrb[27].mxu0  ;;  %v1727_v60 = vpop.f32.mrb[27].mxu1 }
 0x12e   : > { %v1133_v54 = vadd.f32 %v1677_v47, %v1132_v40  ;;  %v1172_v57 = vmul.f32 %v1677_v47, %v1677_v47  ;;  %v1680_v58 = vadd.f32 %v1679_v51, %v1678_v48  ;;  %v2053_v61 = vadd.f32 %v1727_v60, %v1726_v53 }
 0x12f   : > { %v1179_v40 = vmul.f32 %v2013_v15, %v2013_v15  ;;  %v1184_v53 = vmul.f32 %v2035_v7, %v2035_v7 }
 0x130   : > { %v1203_v62 = vadd.f32 %v1202_v43, %v1172_v57  ;;  %v1561_v63 = vpack.c.bf16 %v1680_v58, %v1677_v47  ;;  %v1134_v0 = vadd.f32 %v1680_v58, %v1133_v54  ;;  %v1173_v1 = vmul.f32 %v1680_v58, %v1680_v58 }
 0x131   : > { %v1601_v2 = vpack.c.bf16 %v2053_v61, %v2051_v52  ;;  %v1185_v58 = vmul.f32 %v2037_v14, %v2037_v14 }
 0x132   : > { %1613 = vst [vmem:[%s2003_s12 + $0x30] sm:$0xff] %v1561_v63   ;;  %v1204_v3 = vadd.f32 %v1203_v62, %v1173_v1  ;;  %v1681_v4 = vpop.f32.mrb[28].mxu0  ;;  %v1729_v6 = vpop.f32.mrb[28].mxu1  ;;  %v1186_v62 = vmul.f32 %v2043_v30, %v2043_v30 }
 0x133   : > { %v1682_v5 = vpop.f32.mrb[29].mxu0  ;;  %1621 = vst [vmem:[%s2003_s12 + $0x70] sm:$0xff] %v1601_v2   ;;  %v1730_v11 = vpop.f32.mrb[29].mxu1  ;;  %v1188_v2 = vmul.f32 %v2051_v52, %v2051_v52 }
 0x134   : > { %v1683_v8 = vadd.f32 %v1682_v5, %v1681_v4  ;;  %v1684_v10 = vpop.f32.mrb[30].mxu0  ;;  %v1731_v13 = vadd.f32 %v1730_v11, %v1729_v6  ;;  %v1732_v16 = vpop.f32.mrb[30].mxu1 }
 0x135   : > { %v1685_v12 = vpop.f32.mrb[31].mxu0  ;;  %v1733_v20 = vpop.f32.mrb[31].mxu1 }
 0x136   : > { %v1135_v17 = vadd.f32 %v1683_v8, %v1134_v0  ;;  %v1174_v18 = vmul.f32 %v1683_v8, %v1683_v8  ;;  %v1686_v19 = vadd.f32 %v1685_v12, %v1684_v10  ;;  %v1734_v21 = vadd.f32 %v1733_v20, %v1732_v16 }
 0x137   : > { %v1190_v4 = vmul.f32 %v1731_v13, %v1731_v13 }
 0x138   : > { %v1205_v22 = vadd.f32 %v1204_v3, %v1174_v18  ;;  %v1566_v23 = vpack.c.bf16 %v1686_v19, %v1683_v8  ;;  %v1136_v24 = vadd.f32 %v1686_v19, %v1135_v17  ;;  %v1175_v25 = vmul.f32 %v1686_v19, %v1686_v19 }
 0x139   : > { %v1606_v26 = vpack.c.bf16 %v1734_v21, %v1731_v13  ;;  %v1191_v11 = vmul.f32 %v1734_v21, %v1734_v21 }
 0x13a   : > { %1614 = vst [vmem:[%s2003_s12 + $0x38] sm:$0xff] %v1566_v23   ;;  %v1137_v28 = vadd.f32 %v1998_v55, %v1136_v24  ;;  %v1206_v31 = vadd.f32 %v1205_v22, %v1175_v25 }
 0x13b   : > { %1622 = vst [vmem:[%s2003_s12 + $0x78] sm:$0xff] %v1606_v26  }
 0x13c   : > { %v1138_v33 = vadd.f32 %v2005_v59, %v1137_v28  ;;  %v1207_v34 = vadd.f32 %v1206_v31, %v1176_v27  ;;  %v1181_v59 = vmul.f32 %v2021_v35, %v2021_v35 }
 0x13e   : > { %v1139_v38 = vadd.f32 %v2011_v9, %v1138_v33  ;;  %v1208_v39 = vadd.f32 %v1207_v34, %v1177_v32  ;;  %v1182_v9 = vmul.f32 %v2027_v49, %v2027_v49 }
 0x140   : > { %v1140_v41 = vadd.f32 %v2013_v15, %v1139_v38  ;;  %v1209_v55 = vadd.f32 %v1208_v39, %v1178_v36  ;;  %v1183_v15 = vmul.f32 %v2029_v56, %v2029_v56 }
 0x142   : > { %v1210_v43 = vadd.f32 %v1209_v55, %v1179_v40  ;;  %v1141_v44 = vadd.f32 %v2019_v29, %v1140_v41 }
 0x144   : > { %v1142_v45 = vadd.f32 %v2021_v35, %v1141_v44  ;;  %v1211_v46 = vadd.f32 %v1210_v43, %v1180_v42 }
 0x146   : > { %v1143_v47 = vadd.f32 %v2027_v49, %v1142_v45  ;;  %v1212_v48 = vadd.f32 %v1211_v46, %v1181_v59 }
 0x148   : > { %v1144_v50 = vadd.f32 %v2029_v56, %v1143_v47  ;;  %v1213_v51 = vadd.f32 %v1212_v48, %v1182_v9 }
 0x14a   : > { %v1145_v29 = vadd.f32 %v2035_v7, %v1144_v50  ;;  %v1214_v54 = vadd.f32 %v1213_v51, %v1183_v15  ;;  %v1187_v7 = vmul.f32 %v2045_v37, %v2045_v37 }
 0x14c   : > { %v1215_v35 = vadd.f32 %v1214_v54, %v1184_v53  ;;  %v1146_v57 = vadd.f32 %v2037_v14, %v1145_v29 }
 0x14e   : > { %v1216_v49 = vadd.f32 %v1215_v35, %v1185_v58  ;;  %v1147_v60 = vadd.f32 %v2043_v30, %v1146_v57  ;;  %v1189_v30 = vmul.f32 %v2053_v61, %v2053_v61 }
 0x150   : > { %v1217_v56 = vadd.f32 %v1216_v49, %v1186_v62  ;;  %v1148_v63 = vadd.f32 %v2045_v37, %v1147_v60 }
 0x152   : > { %v1218_v0 = vadd.f32 %v1217_v56, %v1187_v7  ;;  %v1149_v1 = vadd.f32 %v2051_v52, %v1148_v63 }
 0x154   : > { %v1219_v14 = vadd.f32 %v1218_v0, %v1188_v2  ;;  %v1150_v3 = vadd.f32 %v2053_v61, %v1149_v1 }
 0x156   : > { %v1220_v5 = vadd.f32 %v1219_v14, %v1189_v30  ;;  %v1151_v6 = vadd.f32 %v1731_v13, %v1150_v3 }
 0x158   : > { %v1221_v8 = vadd.f32 %v1220_v5, %v1190_v4  ;;  %v1152_v10 = vadd.f32 %v1734_v21, %v1151_v6 }
 0x15a   : > { %v1153_v37 = vrot.slane %v1152_v10, 4  ;;  %v1222_v12 = vadd.f32 %v1221_v8, %v1191_v11 }
 0x15c   : > { %v1154_v16 = vadd.f32 %v1153_v37, %v1152_v10  ;;  %v1223_v17 = vrot.slane %v1222_v12, 4 }
 0x15e   : > { %v1155_v18 = vrot.slane %v1154_v16, 2  ;;  %v1224_v52 = vadd.f32 %v1223_v17, %v1222_v12 }
 0x160   : > { %v1156_v19 = vadd.f32 %v1155_v18, %v1154_v16  ;;  %v1225_v20 = vrot.slane %v1224_v52, 2 }
 0x162   : > { %v1157_v22 = vrot.slane %v1156_v19, 1  ;;  %v1226_v23 = vadd.f32 %v1225_v20, %v1224_v52 }
 0x164   : > { %v1158_v61 = vadd.f32 %v1157_v22, %v1156_v19  ;;  %v1227_v13 = vrot.slane %v1226_v23, 1 }
 0x166   : > { %1159 = vst [vmem:[%s306_s14] sm:$0x1] %v1158_v61  ;;  %v1228_v21 = vadd.f32 %v1227_v13, %v1226_v23 }
 0x168   : > { %1229 = vst [vmem:[%s312_s22] sm:$0x1] %v1228_v21 }
 0x169 PF: > { %s15_s17 = sadd.s32 1, %s1861_s17   ;;  %s2125_s15 = smov %s1857_s16 }
 0x16a   : > { %p12_p6 = scmp.ge.s32.totalorder %s15_s17, 6   ;;  %s2126_s16 = smov %s2128_s18 }
 0x16c   :  { %14 = sbr.rel (!%p12_p6) target bundleno = 2 (0x2), region = 93 }

</bundles_post_ra>
